<compile_context>
chip_gen: v5e
topology: v5e:2x2
jax: 0.10.0
libtpu: 0.0.40
codegen_flags: <defaults>
</compile_context>

<pallas_src>
import functools

import numpy as np

import jax
import jax.numpy as jnp
from jax import lax
from jax.experimental import pallas as pl
from jax.experimental.pallas import tpu as pltpu


# ----------------------------------------------------------------------------
# Fused kernel: LayerNorm + QKV + attention + output projection (per batch).
# ----------------------------------------------------------------------------
def _fused_attention_kernel(x_ref, gamma_ref, beta_ref, bias_ref,
                            wqkv_ref, wp_ref, bp_ref,
                            o_ref,
                            qkv_vmem, grp_vmem,
                            *, heads, dim_head, seq, scale):
    n = seq
    dh = dim_head
    inner = heads * dh
    dim = o_ref.shape[-1]

    # ---- LayerNorm over dim (f32 vector math, like torch) -------------------
    x = x_ref[0].astype(jnp.float32)                           # (n, dim)
    mean = jnp.mean(x, axis=-1, keepdims=True)
    var = jnp.mean((x - mean) ** 2, axis=-1, keepdims=True)    # biased variance
    xn = (x - mean) * lax.rsqrt(var + 1e-5)
    xn = xn * gamma_ref[...] + beta_ref[...]                   # (n, dim)

    # ---- single concatenated Q|K|V projection: one lane-dense MXU pass ------
    qkv = jnp.dot(xn.astype(jnp.bfloat16), wqkv_ref[...],
                  preferred_element_type=jnp.float32)          # (n, 3*inner) f32
    qkv_vmem[...] = qkv

    # ---- regroup (n, inner) -> (heads*n, dh), chunk-major, via VMEM refs ----
    # grp[t][c*n + r, :] == tensor_t[r, c*dh:(c+1)*dh]   (t = 0:Q, 1:K, 2:V)
    for t in range(3):
        for c in range(heads):
            lo = t * inner + c * dh
            grp_vmem[t, c * n:(c + 1) * n, :] = qkv_vmem[:, lo:lo + dh]

    qg = grp_vmem[0]                                           # (heads*n, dh)
    kg = grp_vmem[1]
    vg = grp_vmem[2]

    # ---- per-head attention as one masked Gram matmul -----------------------
    # scale folded into q; contraction on last dims (no explicit transpose).
    qb = (qg * scale).astype(jnp.bfloat16)
    kb = kg.astype(jnp.bfloat16)
    dots = lax.dot_general(qb, kb, (((1,), (1,)), ((), ())),
                           preferred_element_type=jnp.float32)  # (hn, hn)
    dots = dots + bias_ref[...]            # -1e30 on cross-head entries

    m = jnp.max(dots, axis=-1, keepdims=True)
    e = jnp.exp(dots - m)
    s = jnp.sum(e, axis=-1, keepdims=True)
    attn = e * pl.reciprocal(s, approx=True)                    # softmax rows

    og = jnp.dot(attn.astype(jnp.bfloat16), vg.astype(jnp.bfloat16),
                 preferred_element_type=jnp.float32)            # (heads*n, dh)

    # ---- output projection: out[t] = sum_c og[c*n + t] @ Wp[c*dh:(c+1)*dh] --
    acc = jnp.zeros((n, dim), jnp.float32)
    for c in range(heads):
        o_c = og[c * n:(c + 1) * n, :].astype(jnp.bfloat16)     # (n, dh)
        w_c = wp_ref[c * dh:(c + 1) * dh, :]                    # (dh, dim) bf16
        acc = acc + jnp.dot(o_c, w_c, preferred_element_type=jnp.float32)

    o_ref[0] = acc + bp_ref[...]


# ----------------------------------------------------------------------------
# Wrapper: weight packing, cross-head mask, pallas_call.
# ----------------------------------------------------------------------------
def attention_forward(x, params, heads, dim_head):
    b, n, dim = x.shape
    inner = heads * dim_head
    hn = heads * n
    scale = dim_head ** (-0.5)

    # Concatenate the three bias-free projections into one (dim, 3*inner)
    # weight; bf16 MXU operands (f32 accumulation happens in-kernel).
    wqkv = jnp.concatenate(
        [params["wq"], params["wk"], params["wv"]], axis=1).astype(jnp.bfloat16)
    wp = params["wp"].astype(jnp.bfloat16)
    gamma = params["gamma"].astype(jnp.float32)
    beta = params["beta"].astype(jnp.float32)
    bp = params["bp"].astype(jnp.float32)

    # Additive cross-head mask for the chunk-major grouped layout:
    # grouped row i = c*n + r  <->  flat head index f = r*heads + c, head = f // n.
    idx = np.arange(hn)
    c_idx, r_idx = idx // n, idx % n
    head_id = (r_idx * heads + c_idx) // n
    bias = np.where(head_id[:, None] == head_id[None, :],
                    0.0, -1e30).astype(np.float32)
    bias = jnp.asarray(bias)                                    # (hn, hn)

    kernel = functools.partial(_fused_attention_kernel, heads=heads,
                               dim_head=dim_head, seq=n, scale=scale)

    return pl.pallas_call(
        kernel,
        out_shape=jax.ShapeDtypeStruct((b, n, dim), jnp.float32),
        grid=(b,),
        in_specs=[
            pl.BlockSpec((1, n, dim), lambda i: (i, 0, 0)),      # x
            pl.BlockSpec((1, dim), lambda i: (0, 0)),            # gamma
            pl.BlockSpec((1, dim), lambda i: (0, 0)),            # beta
            pl.BlockSpec((hn, hn), lambda i: (0, 0)),            # head mask bias
            pl.BlockSpec((dim, 3 * inner), lambda i: (0, 0)),    # Wqkv (bf16)
            pl.BlockSpec((inner, dim), lambda i: (0, 0)),        # Wp   (bf16)
            pl.BlockSpec((1, dim), lambda i: (0, 0)),            # bp
        ],
        out_specs=pl.BlockSpec((1, n, dim), lambda i: (i, 0, 0)),
        scratch_shapes=[
            pltpu.VMEM((n, 3 * inner), jnp.float32),             # QKV slab
            pltpu.VMEM((3, hn, dim_head), jnp.float32),          # grouped Q/K/V
        ],
        compiler_params=pltpu.CompilerParams(
            dimension_semantics=("parallel",)),
    )(x, gamma, beta, bias, wqkv, wp, bp)


# ----------------------------------------------------------------------------
# Pure-JAX reference (matches the PyTorch module exactly, incl. plain reshape).
# ----------------------------------------------------------------------------
def reference_forward(x, params, heads, dim_head):
    b, n, dim = x.shape
    inner = heads * dim_head
    mean = jnp.mean(x, -1, keepdims=True)
    var = jnp.mean((x - mean) ** 2, -1, keepdims=True)
    xn = (x - mean) / jnp.sqrt(var + 1e-5) * params["gamma"] + params["beta"]
    q = (xn @ params["wq"]).reshape(b, heads, n, dim_head)
    k = (xn @ params["wk"]).reshape(b, heads, n, dim_head)
    v = (xn @ params["wv"]).reshape(b, heads, n, dim_head)
    dots = jnp.einsum("bhnd,bhmd->bhnm", q, k) * (dim_head ** -0.5)
    attn = jax.nn.softmax(dots, axis=-1)
    out = jnp.einsum("bhnm,bhmd->bhnd", attn, v).reshape(b, n, inner)
    return out @ params["wp"] + params["bp"]


if __name__ == "__main__":
    # Small shapes: batch=2, seq=8, dim=32; module defaults heads=8, dim_head=64.
    B, N, DIM = 2, 8, 32
    HEADS, DIM_HEAD = 8, 64
    INNER = HEADS * DIM_HEAD

    key = jax.random.PRNGKey(0)
    kx, kg, kb, kq, kk, kv, kp, kpb = jax.random.split(key, 8)

    x = jax.random.normal(kx, (B, N, DIM), dtype=jnp.float32)

    # Linear weights stored already transposed to (in, out): y = x @ W.
    params = {
        "gamma": 1.0 + 0.1 * jax.random.normal(kg, (1, DIM), jnp.float32),
        "beta": 0.1 * jax.random.normal(kb, (1, DIM), jnp.float32),
        "wq": 0.05 * jax.random.normal(kq, (DIM, INNER), jnp.float32),
        "wk": 0.05 * jax.random.normal(kk, (DIM, INNER), jnp.float32),
        "wv": 0.05 * jax.random.normal(kv, (DIM, INNER), jnp.float32),
        "wp": 0.05 * jax.random.normal(kp, (INNER, DIM), jnp.float32),
        "bp": 0.05 * jax.random.normal(kpb, (1, DIM), jnp.float32),
    }

    out = attention_forward(x, params, HEADS, DIM_HEAD)
    out = jax.block_until_ready(out)

    ref = reference_forward(x, params, HEADS, DIM_HEAD)
    assert out.shape == (B, N, DIM), out.shape
    # bf16 MXU operands + approx reciprocal -> slightly looser tolerance.
    assert jnp.allclose(out, ref, rtol=2e-2, atol=2e-2), (
        float(jnp.max(jnp.abs(out - ref))))

    print("KERNEL_OK")
</pallas_src>

<mosaic_0001>
module attributes {stable_mosaic.version = 11 : i64} {
  func.func @_fused_attention_kernel(%arg0: i32, %arg1: memref<1x8x32xf32, #tpu.memory_space<vmem>>, %arg2: memref<1x32xf32, #tpu.memory_space<vmem>>, %arg3: memref<1x32xf32, #tpu.memory_space<vmem>>, %arg4: memref<64x64xf32, #tpu.memory_space<vmem>>, %arg5: memref<32x1536xbf16, #tpu.memory_space<vmem>>, %arg6: memref<512x32xbf16, #tpu.memory_space<vmem>>, %arg7: memref<1x32xf32, #tpu.memory_space<vmem>>, %arg8: memref<1x8x32xf32, #tpu.memory_space<vmem>>, %arg9: memref<8x1536xf32, #tpu.memory_space<vmem>>, %arg10: memref<3x64x64xf32, #tpu.memory_space<vmem>>) attributes {dimension_semantics = [#tpu.dimension_semantics<parallel>], iteration_bounds = array<i64: 2>, scalar_prefetch = 0 : i64, scratch_operands = 2 : i64, tpu.core_type = #tpu.core_type<tc>, window_params = [{transform_indices = @transform_0, window_bounds = array<i64: 1, 8, 32>}, {pipeline_mode = #tpu.pipeline_mode<synchronous>, transform_indices = @transform_1, window_bounds = array<i64: 1, 32>}, {pipeline_mode = #tpu.pipeline_mode<synchronous>, transform_indices = @transform_2, window_bounds = array<i64: 1, 32>}, {pipeline_mode = #tpu.pipeline_mode<synchronous>, transform_indices = @transform_3, window_bounds = array<i64: 64, 64>}, {pipeline_mode = #tpu.pipeline_mode<synchronous>, transform_indices = @transform_4, window_bounds = array<i64: 32, 1536>}, {pipeline_mode = #tpu.pipeline_mode<synchronous>, transform_indices = @transform_5, window_bounds = array<i64: 512, 32>}, {pipeline_mode = #tpu.pipeline_mode<synchronous>, transform_indices = @transform_6, window_bounds = array<i64: 1, 32>}, {transform_indices = @transform_7, window_bounds = array<i64: 1, 8, 32>}]} {
    %c0 = arith.constant 0 : index
    %c0_0 = arith.constant 0 : index
    %c0_1 = arith.constant 0 : index
    %0 = vector.load %arg1[%c0, %c0_0, %c0_1] : memref<1x8x32xf32, #tpu.memory_space<vmem>>, vector<1x8x32xf32>
    %1 = vector.shape_cast %0 : vector<1x8x32xf32> to vector<8x32xf32>
    %cst = arith.constant dense<0.000000e+00> : vector<8xf32>
    %2 = vector.multi_reduction <add>, %1, %cst [1] : vector<8x32xf32> to vector<8xf32>
    %3 = vector.shape_cast %2 : vector<8xf32> to vector<8x1xf32>
    %cst_2 = arith.constant 3.200000e+01 : f32
    %4 = vector.broadcast %cst_2 : f32 to vector<8x1xf32>
    %5 = arith.divf %3, %4 : vector<8x1xf32>
    %6 = vector.broadcast %5 : vector<8x1xf32> to vector<8x32xf32>
    %7 = arith.subf %1, %6 : vector<8x32xf32>
    %8 = arith.mulf %7, %7 : vector<8x32xf32>
    %cst_3 = arith.constant dense<0.000000e+00> : vector<8xf32>
    %9 = vector.multi_reduction <add>, %8, %cst_3 [1] : vector<8x32xf32> to vector<8xf32>
    %10 = vector.shape_cast %9 : vector<8xf32> to vector<8x1xf32>
    %cst_4 = arith.constant 3.200000e+01 : f32
    %11 = vector.broadcast %cst_4 : f32 to vector<8x1xf32>
    %12 = arith.divf %10, %11 : vector<8x1xf32>
    %13 = vector.broadcast %5 : vector<8x1xf32> to vector<8x32xf32>
    %14 = arith.subf %1, %13 : vector<8x32xf32>
    %cst_5 = arith.constant 9.99999974E-6 : f32
    %15 = vector.broadcast %cst_5 : f32 to vector<8x1xf32>
    %16 = arith.addf %12, %15 : vector<8x1xf32>
    %17 = math.rsqrt %16 : vector<8x1xf32>
    %18 = vector.broadcast %17 : vector<8x1xf32> to vector<8x32xf32>
    %19 = arith.mulf %14, %18 : vector<8x32xf32>
    %c0_6 = arith.constant 0 : index
    %c0_7 = arith.constant 0 : index
    %20 = vector.load %arg2[%c0_6, %c0_7] : memref<1x32xf32, #tpu.memory_space<vmem>>, vector<1x32xf32>
    %21 = vector.broadcast %20 : vector<1x32xf32> to vector<8x32xf32>
    %22 = arith.mulf %19, %21 : vector<8x32xf32>
    %c0_8 = arith.constant 0 : index
    %c0_9 = arith.constant 0 : index
    %23 = vector.load %arg3[%c0_8, %c0_9] : memref<1x32xf32, #tpu.memory_space<vmem>>, vector<1x32xf32>
    %24 = vector.broadcast %23 : vector<1x32xf32> to vector<8x32xf32>
    %25 = arith.addf %22, %24 : vector<8x32xf32>
    %26 = arith.truncf %25 : vector<8x32xf32> to vector<8x32xbf16>
    %c0_10 = arith.constant 0 : index
    %c0_11 = arith.constant 0 : index
    %27 = vector.load %arg5[%c0_10, %c0_11] : memref<32x1536xbf16, #tpu.memory_space<vmem>>, vector<32x1536xbf16>
    %cst_12 = arith.constant dense<0.000000e+00> : vector<8x1536xf32>
    %28 = tpu.matmul %26, %27, %cst_12 {dimension_numbers = #tpu.dot_dimension_numbers<[1], [0], [0], [1], [0, 0, 1, 1], [], []>} : vector<8x32xbf16>, vector<32x1536xbf16>, vector<8x1536xf32> -> vector<8x1536xf32>
    %c0_13 = arith.constant 0 : index
    %c0_14 = arith.constant 0 : index
    %29 = vector.load %arg9[%c0_13, %c0_14] : memref<8x1536xf32, #tpu.memory_space<vmem>>, vector<8x1536xf32>
    tpu.vector_store %arg9[%c0_13, %c0_14], %28 {strides = array<i32>} : memref<8x1536xf32, #tpu.memory_space<vmem>>, vector<8x1536xf32>,
    %c0_15 = arith.constant 0 : index
    %c0_16 = arith.constant 0 : index
    %30 = vector.load %arg9[%c0_15, %c0_16] : memref<8x1536xf32, #tpu.memory_space<vmem>>, vector<8x64xf32>
    %c0_17 = arith.constant 0 : index
    %c0_18 = arith.constant 0 : index
    %c0_19 = arith.constant 0 : index
    %31 = vector.load %arg10[%c0_17, %c0_18, %c0_19] : memref<3x64x64xf32, #tpu.memory_space<vmem>>, vector<1x8x64xf32>
    %32 = vector.shape_cast %31 : vector<1x8x64xf32> to vector<8x64xf32>
    %33 = vector.shape_cast %30 : vector<8x64xf32> to vector<1x8x64xf32>
    tpu.vector_store %arg10[%c0_17, %c0_18, %c0_19], %33 {strides = array<i32>} : memref<3x64x64xf32, #tpu.memory_space<vmem>>, vector<1x8x64xf32>,
    %c0_20 = arith.constant 0 : index
    %c64 = arith.constant 64 : index
    %34 = vector.load %arg9[%c0_20, %c64] : memref<8x1536xf32, #tpu.memory_space<vmem>>, vector<8x64xf32>
    %c0_21 = arith.constant 0 : index
    %c8 = arith.constant 8 : index
    %c0_22 = arith.constant 0 : index
    %35 = vector.load %arg10[%c0_21, %c8, %c0_22] : memref<3x64x64xf32, #tpu.memory_space<vmem>>, vector<1x8x64xf32>
    %36 = vector.shape_cast %35 : vector<1x8x64xf32> to vector<8x64xf32>
    %37 = vector.shape_cast %34 : vector<8x64xf32> to vector<1x8x64xf32>
    tpu.vector_store %arg10[%c0_21, %c8, %c0_22], %37 {strides = array<i32>} : memref<3x64x64xf32, #tpu.memory_space<vmem>>, vector<1x8x64xf32>,
    %c0_23 = arith.constant 0 : index
    %c128 = arith.constant 128 : index
    %38 = vector.load %arg9[%c0_23, %c128] : memref<8x1536xf32, #tpu.memory_space<vmem>>, vector<8x64xf32>
    %c0_24 = arith.constant 0 : index
    %c16 = arith.constant 16 : index
    %c0_25 = arith.constant 0 : index
    %39 = vector.load %arg10[%c0_24, %c16, %c0_25] : memref<3x64x64xf32, #tpu.memory_space<vmem>>, vector<1x8x64xf32>
    %40 = vector.shape_cast %39 : vector<1x8x64xf32> to vector<8x64xf32>
    %41 = vector.shape_cast %38 : vector<8x64xf32> to vector<1x8x64xf32>
    tpu.vector_store %arg10[%c0_24, %c16, %c0_25], %41 {strides = array<i32>} : memref<3x64x64xf32, #tpu.memory_space<vmem>>, vector<1x8x64xf32>,
    %c0_26 = arith.constant 0 : index
    %c192 = arith.constant 192 : index
    %42 = vector.load %arg9[%c0_26, %c192] : memref<8x1536xf32, #tpu.memory_space<vmem>>, vector<8x64xf32>
    %c0_27 = arith.constant 0 : index
    %c24 = arith.constant 24 : index
    %c0_28 = arith.constant 0 : index
    %43 = vector.load %arg10[%c0_27, %c24, %c0_28] : memref<3x64x64xf32, #tpu.memory_space<vmem>>, vector<1x8x64xf32>
    %44 = vector.shape_cast %43 : vector<1x8x64xf32> to vector<8x64xf32>
    %45 = vector.shape_cast %42 : vector<8x64xf32> to vector<1x8x64xf32>
    tpu.vector_store %arg10[%c0_27, %c24, %c0_28], %45 {strides = array<i32>} : memref<3x64x64xf32, #tpu.memory_space<vmem>>, vector<1x8x64xf32>,
    %c0_29 = arith.constant 0 : index
    %c256 = arith.constant 256 : index
    %46 = vector.load %arg9[%c0_29, %c256] : memref<8x1536xf32, #tpu.memory_space<vmem>>, vector<8x64xf32>
    %c0_30 = arith.constant 0 : index
    %c32 = arith.constant 32 : index
    %c0_31 = arith.constant 0 : index
    %47 = vector.load %arg10[%c0_30, %c32, %c0_31] : memref<3x64x64xf32, #tpu.memory_space<vmem>>, vector<1x8x64xf32>
    %48 = vector.shape_cast %47 : vector<1x8x64xf32> to vector<8x64xf32>
    %49 = vector.shape_cast %46 : vector<8x64xf32> to vector<1x8x64xf32>
    tpu.vector_store %arg10[%c0_30, %c32, %c0_31], %49 {strides = array<i32>} : memref<3x64x64xf32, #tpu.memory_space<vmem>>, vector<1x8x64xf32>,
    %c0_32 = arith.constant 0 : index
    %c320 = arith.constant 320 : index
    %50 = vector.load %arg9[%c0_32, %c320] : memref<8x1536xf32, #tpu.memory_space<vmem>>, vector<8x64xf32>
    %c0_33 = arith.constant 0 : index
    %c40 = arith.constant 40 : index
    %c0_34 = arith.constant 0 : index
    %51 = vector.load %arg10[%c0_33, %c40, %c0_34] : memref<3x64x64xf32, #tpu.memory_space<vmem>>, vector<1x8x64xf32>
    %52 = vector.shape_cast %51 : vector<1x8x64xf32> to vector<8x64xf32>
    %53 = vector.shape_cast %50 : vector<8x64xf32> to vector<1x8x64xf32>
    tpu.vector_store %arg10[%c0_33, %c40, %c0_34], %53 {strides = array<i32>} : memref<3x64x64xf32, #tpu.memory_space<vmem>>, vector<1x8x64xf32>,
    %c0_35 = arith.constant 0 : index
    %c384 = arith.constant 384 : index
    %54 = vector.load %arg9[%c0_35, %c384] : memref<8x1536xf32, #tpu.memory_space<vmem>>, vector<8x64xf32>
    %c0_36 = arith.constant 0 : index
    %c48 = arith.constant 48 : index
    %c0_37 = arith.constant 0 : index
    %55 = vector.load %arg10[%c0_36, %c48, %c0_37] : memref<3x64x64xf32, #tpu.memory_space<vmem>>, vector<1x8x64xf32>
    %56 = vector.shape_cast %55 : vector<1x8x64xf32> to vector<8x64xf32>
    %57 = vector.shape_cast %54 : vector<8x64xf32> to vector<1x8x64xf32>
    tpu.vector_store %arg10[%c0_36, %c48, %c0_37], %57 {strides = array<i32>} : memref<3x64x64xf32, #tpu.memory_space<vmem>>, vector<1x8x64xf32>,
    %c0_38 = arith.constant 0 : index
    %c448 = arith.constant 448 : index
    %58 = vector.load %arg9[%c0_38, %c448] : memref<8x1536xf32, #tpu.memory_space<vmem>>, vector<8x64xf32>
    %c0_39 = arith.constant 0 : index
    %c56 = arith.constant 56 : index
    %c0_40 = arith.constant 0 : index
    %59 = vector.load %arg10[%c0_39, %c56, %c0_40] : memref<3x64x64xf32, #tpu.memory_space<vmem>>, vector<1x8x64xf32>
    %60 = vector.shape_cast %59 : vector<1x8x64xf32> to vector<8x64xf32>
    %61 = vector.shape_cast %58 : vector<8x64xf32> to vector<1x8x64xf32>
    tpu.vector_store %arg10[%c0_39, %c56, %c0_40], %61 {strides = array<i32>} : memref<3x64x64xf32, #tpu.memory_space<vmem>>, vector<1x8x64xf32>,
    %c0_41 = arith.constant 0 : index
    %c512 = arith.constant 512 : index
    %62 = vector.load %arg9[%c0_41, %c512] : memref<8x1536xf32, #tpu.memory_space<vmem>>, vector<8x64xf32>
    %c1 = arith.constant 1 : index
    %c0_42 = arith.constant 0 : index
    %c0_43 = arith.constant 0 : index
    %63 = vector.load %arg10[%c1, %c0_42, %c0_43] : memref<3x64x64xf32, #tpu.memory_space<vmem>>, vector<1x8x64xf32>
    %64 = vector.shape_cast %63 : vector<1x8x64xf32> to vector<8x64xf32>
    %65 = vector.shape_cast %62 : vector<8x64xf32> to vector<1x8x64xf32>
    tpu.vector_store %arg10[%c1, %c0_42, %c0_43], %65 {strides = array<i32>} : memref<3x64x64xf32, #tpu.memory_space<vmem>>, vector<1x8x64xf32>,
    %c0_44 = arith.constant 0 : index
    %c576 = arith.constant 576 : index
    %66 = vector.load %arg9[%c0_44, %c576] : memref<8x1536xf32, #tpu.memory_space<vmem>>, vector<8x64xf32>
    %c1_45 = arith.constant 1 : index
    %c8_46 = arith.constant 8 : index
    %c0_47 = arith.constant 0 : index
    %67 = vector.load %arg10[%c1_45, %c8_46, %c0_47] : memref<3x64x64xf32, #tpu.memory_space<vmem>>, vector<1x8x64xf32>
    %68 = vector.shape_cast %67 : vector<1x8x64xf32> to vector<8x64xf32>
    %69 = vector.shape_cast %66 : vector<8x64xf32> to vector<1x8x64xf32>
    tpu.vector_store %arg10[%c1_45, %c8_46, %c0_47], %69 {strides = array<i32>} : memref<3x64x64xf32, #tpu.memory_space<vmem>>, vector<1x8x64xf32>,
    %c0_48 = arith.constant 0 : index
    %c640 = arith.constant 640 : index
    %70 = vector.load %arg9[%c0_48, %c640] : memref<8x1536xf32, #tpu.memory_space<vmem>>, vector<8x64xf32>
    %c1_49 = arith.constant 1 : index
    %c16_50 = arith.constant 16 : index
    %c0_51 = arith.constant 0 : index
    %71 = vector.load %arg10[%c1_49, %c16_50, %c0_51] : memref<3x64x64xf32, #tpu.memory_space<vmem>>, vector<1x8x64xf32>
    %72 = vector.shape_cast %71 : vector<1x8x64xf32> to vector<8x64xf32>
    %73 = vector.shape_cast %70 : vector<8x64xf32> to vector<1x8x64xf32>
    tpu.vector_store %arg10[%c1_49, %c16_50, %c0_51], %73 {strides = array<i32>} : memref<3x64x64xf32, #tpu.memory_space<vmem>>, vector<1x8x64xf32>,
    %c0_52 = arith.constant 0 : index
    %c704 = arith.constant 704 : index
    %74 = vector.load %arg9[%c0_52, %c704] : memref<8x1536xf32, #tpu.memory_space<vmem>>, vector<8x64xf32>
    %c1_53 = arith.constant 1 : index
    %c24_54 = arith.constant 24 : index
    %c0_55 = arith.constant 0 : index
    %75 = vector.load %arg10[%c1_53, %c24_54, %c0_55] : memref<3x64x64xf32, #tpu.memory_space<vmem>>, vector<1x8x64xf32>
    %76 = vector.shape_cast %75 : vector<1x8x64xf32> to vector<8x64xf32>
    %77 = vector.shape_cast %74 : vector<8x64xf32> to vector<1x8x64xf32>
    tpu.vector_store %arg10[%c1_53, %c24_54, %c0_55], %77 {strides = array<i32>} : memref<3x64x64xf32, #tpu.memory_space<vmem>>, vector<1x8x64xf32>,
    %c0_56 = arith.constant 0 : index
    %c768 = arith.constant 768 : index
    %78 = vector.load %arg9[%c0_56, %c768] : memref<8x1536xf32, #tpu.memory_space<vmem>>, vector<8x64xf32>
    %c1_57 = arith.constant 1 : index
    %c32_58 = arith.constant 32 : index
    %c0_59 = arith.constant 0 : index
    %79 = vector.load %arg10[%c1_57, %c32_58, %c0_59] : memref<3x64x64xf32, #tpu.memory_space<vmem>>, vector<1x8x64xf32>
    %80 = vector.shape_cast %79 : vector<1x8x64xf32> to vector<8x64xf32>
    %81 = vector.shape_cast %78 : vector<8x64xf32> to vector<1x8x64xf32>
    tpu.vector_store %arg10[%c1_57, %c32_58, %c0_59], %81 {strides = array<i32>} : memref<3x64x64xf32, #tpu.memory_space<vmem>>, vector<1x8x64xf32>,
    %c0_60 = arith.constant 0 : index
    %c832 = arith.constant 832 : index
    %82 = vector.load %arg9[%c0_60, %c832] : memref<8x1536xf32, #tpu.memory_space<vmem>>, vector<8x64xf32>
    %c1_61 = arith.constant 1 : index
    %c40_62 = arith.constant 40 : index
    %c0_63 = arith.constant 0 : index
    %83 = vector.load %arg10[%c1_61, %c40_62, %c0_63] : memref<3x64x64xf32, #tpu.memory_space<vmem>>, vector<1x8x64xf32>
    %84 = vector.shape_cast %83 : vector<1x8x64xf32> to vector<8x64xf32>
    %85 = vector.shape_cast %82 : vector<8x64xf32> to vector<1x8x64xf32>
    tpu.vector_store %arg10[%c1_61, %c40_62, %c0_63], %85 {strides = array<i32>} : memref<3x64x64xf32, #tpu.memory_space<vmem>>, vector<1x8x64xf32>,
    %c0_64 = arith.constant 0 : index
    %c896 = arith.constant 896 : index
    %86 = vector.load %arg9[%c0_64, %c896] : memref<8x1536xf32, #tpu.memory_space<vmem>>, vector<8x64xf32>
    %c1_65 = arith.constant 1 : index
    %c48_66 = arith.constant 48 : index
    %c0_67 = arith.constant 0 : index
    %87 = vector.load %arg10[%c1_65, %c48_66, %c0_67] : memref<3x64x64xf32, #tpu.memory_space<vmem>>, vector<1x8x64xf32>
    %88 = vector.shape_cast %87 : vector<1x8x64xf32> to vector<8x64xf32>
    %89 = vector.shape_cast %86 : vector<8x64xf32> to vector<1x8x64xf32>
    tpu.vector_store %arg10[%c1_65, %c48_66, %c0_67], %89 {strides = array<i32>} : memref<3x64x64xf32, #tpu.memory_space<vmem>>, vector<1x8x64xf32>,
    %c0_68 = arith.constant 0 : index
    %c960 = arith.constant 960 : index
    %90 = vector.load %arg9[%c0_68, %c960] : memref<8x1536xf32, #tpu.memory_space<vmem>>, vector<8x64xf32>
    %c1_69 = arith.constant 1 : index
    %c56_70 = arith.constant 56 : index
    %c0_71 = arith.constant 0 : index
    %91 = vector.load %arg10[%c1_69, %c56_70, %c0_71] : memref<3x64x64xf32, #tpu.memory_space<vmem>>, vector<1x8x64xf32>
    %92 = vector.shape_cast %91 : vector<1x8x64xf32> to vector<8x64xf32>
    %93 = vector.shape_cast %90 : vector<8x64xf32> to vector<1x8x64xf32>
    tpu.vector_store %arg10[%c1_69, %c56_70, %c0_71], %93 {strides = array<i32>} : memref<3x64x64xf32, #tpu.memory_space<vmem>>, vector<1x8x64xf32>,
    %c0_72 = arith.constant 0 : index
    %c1024 = arith.constant 1024 : index
    %94 = vector.load %arg9[%c0_72, %c1024] : memref<8x1536xf32, #tpu.memory_space<vmem>>, vector<8x64xf32>
    %c2 = arith.constant 2 : index
    %c0_73 = arith.constant 0 : index
    %c0_74 = arith.constant 0 : index
    %95 = vector.load %arg10[%c2, %c0_73, %c0_74] : memref<3x64x64xf32, #tpu.memory_space<vmem>>, vector<1x8x64xf32>
    %96 = vector.shape_cast %95 : vector<1x8x64xf32> to vector<8x64xf32>
    %97 = vector.shape_cast %94 : vector<8x64xf32> to vector<1x8x64xf32>
    tpu.vector_store %arg10[%c2, %c0_73, %c0_74], %97 {strides = array<i32>} : memref<3x64x64xf32, #tpu.memory_space<vmem>>, vector<1x8x64xf32>,
    %c0_75 = arith.constant 0 : index
    %c1088 = arith.constant 1088 : index
    %98 = vector.load %arg9[%c0_75, %c1088] : memref<8x1536xf32, #tpu.memory_space<vmem>>, vector<8x64xf32>
    %c2_76 = arith.constant 2 : index
    %c8_77 = arith.constant 8 : index
    %c0_78 = arith.constant 0 : index
    %99 = vector.load %arg10[%c2_76, %c8_77, %c0_78] : memref<3x64x64xf32, #tpu.memory_space<vmem>>, vector<1x8x64xf32>
    %100 = vector.shape_cast %99 : vector<1x8x64xf32> to vector<8x64xf32>
    %101 = vector.shape_cast %98 : vector<8x64xf32> to vector<1x8x64xf32>
    tpu.vector_store %arg10[%c2_76, %c8_77, %c0_78], %101 {strides = array<i32>} : memref<3x64x64xf32, #tpu.memory_space<vmem>>, vector<1x8x64xf32>,
    %c0_79 = arith.constant 0 : index
    %c1152 = arith.constant 1152 : index
    %102 = vector.load %arg9[%c0_79, %c1152] : memref<8x1536xf32, #tpu.memory_space<vmem>>, vector<8x64xf32>
    %c2_80 = arith.constant 2 : index
    %c16_81 = arith.constant 16 : index
    %c0_82 = arith.constant 0 : index
    %103 = vector.load %arg10[%c2_80, %c16_81, %c0_82] : memref<3x64x64xf32, #tpu.memory_space<vmem>>, vector<1x8x64xf32>
    %104 = vector.shape_cast %103 : vector<1x8x64xf32> to vector<8x64xf32>
    %105 = vector.shape_cast %102 : vector<8x64xf32> to vector<1x8x64xf32>
    tpu.vector_store %arg10[%c2_80, %c16_81, %c0_82], %105 {strides = array<i32>} : memref<3x64x64xf32, #tpu.memory_space<vmem>>, vector<1x8x64xf32>,
    %c0_83 = arith.constant 0 : index
    %c1216 = arith.constant 1216 : index
    %106 = vector.load %arg9[%c0_83, %c1216] : memref<8x1536xf32, #tpu.memory_space<vmem>>, vector<8x64xf32>
    %c2_84 = arith.constant 2 : index
    %c24_85 = arith.constant 24 : index
    %c0_86 = arith.constant 0 : index
    %107 = vector.load %arg10[%c2_84, %c24_85, %c0_86] : memref<3x64x64xf32, #tpu.memory_space<vmem>>, vector<1x8x64xf32>
    %108 = vector.shape_cast %107 : vector<1x8x64xf32> to vector<8x64xf32>
    %109 = vector.shape_cast %106 : vector<8x64xf32> to vector<1x8x64xf32>
    tpu.vector_store %arg10[%c2_84, %c24_85, %c0_86], %109 {strides = array<i32>} : memref<3x64x64xf32, #tpu.memory_space<vmem>>, vector<1x8x64xf32>,
    %c0_87 = arith.constant 0 : index
    %c1280 = arith.constant 1280 : index
    %110 = vector.load %arg9[%c0_87, %c1280] : memref<8x1536xf32, #tpu.memory_space<vmem>>, vector<8x64xf32>
    %c2_88 = arith.constant 2 : index
    %c32_89 = arith.constant 32 : index
    %c0_90 = arith.constant 0 : index
    %111 = vector.load %arg10[%c2_88, %c32_89, %c0_90] : memref<3x64x64xf32, #tpu.memory_space<vmem>>, vector<1x8x64xf32>
    %112 = vector.shape_cast %111 : vector<1x8x64xf32> to vector<8x64xf32>
    %113 = vector.shape_cast %110 : vector<8x64xf32> to vector<1x8x64xf32>
    tpu.vector_store %arg10[%c2_88, %c32_89, %c0_90], %113 {strides = array<i32>} : memref<3x64x64xf32, #tpu.memory_space<vmem>>, vector<1x8x64xf32>,
    %c0_91 = arith.constant 0 : index
    %c1344 = arith.constant 1344 : index
    %114 = vector.load %arg9[%c0_91, %c1344] : memref<8x1536xf32, #tpu.memory_space<vmem>>, vector<8x64xf32>
    %c2_92 = arith.constant 2 : index
    %c40_93 = arith.constant 40 : index
    %c0_94 = arith.constant 0 : index
    %115 = vector.load %arg10[%c2_92, %c40_93, %c0_94] : memref<3x64x64xf32, #tpu.memory_space<vmem>>, vector<1x8x64xf32>
    %116 = vector.shape_cast %115 : vector<1x8x64xf32> to vector<8x64xf32>
    %117 = vector.shape_cast %114 : vector<8x64xf32> to vector<1x8x64xf32>
    tpu.vector_store %arg10[%c2_92, %c40_93, %c0_94], %117 {strides = array<i32>} : memref<3x64x64xf32, #tpu.memory_space<vmem>>, vector<1x8x64xf32>,
    %c0_95 = arith.constant 0 : index
    %c1408 = arith.constant 1408 : index
    %118 = vector.load %arg9[%c0_95, %c1408] : memref<8x1536xf32, #tpu.memory_space<vmem>>, vector<8x64xf32>
    %c2_96 = arith.constant 2 : index
    %c48_97 = arith.constant 48 : index
    %c0_98 = arith.constant 0 : index
    %119 = vector.load %arg10[%c2_96, %c48_97, %c0_98] : memref<3x64x64xf32, #tpu.memory_space<vmem>>, vector<1x8x64xf32>
    %120 = vector.shape_cast %119 : vector<1x8x64xf32> to vector<8x64xf32>
    %121 = vector.shape_cast %118 : vector<8x64xf32> to vector<1x8x64xf32>
    tpu.vector_store %arg10[%c2_96, %c48_97, %c0_98], %121 {strides = array<i32>} : memref<3x64x64xf32, #tpu.memory_space<vmem>>, vector<1x8x64xf32>,
    %c0_99 = arith.constant 0 : index
    %c1472 = arith.constant 1472 : index
    %122 = vector.load %arg9[%c0_99, %c1472] : memref<8x1536xf32, #tpu.memory_space<vmem>>, vector<8x64xf32>
    %c2_100 = arith.constant 2 : index
    %c56_101 = arith.constant 56 : index
    %c0_102 = arith.constant 0 : index
    %123 = vector.load %arg10[%c2_100, %c56_101, %c0_102] : memref<3x64x64xf32, #tpu.memory_space<vmem>>, vector<1x8x64xf32>
    %124 = vector.shape_cast %123 : vector<1x8x64xf32> to vector<8x64xf32>
    %125 = vector.shape_cast %122 : vector<8x64xf32> to vector<1x8x64xf32>
    tpu.vector_store %arg10[%c2_100, %c56_101, %c0_102], %125 {strides = array<i32>} : memref<3x64x64xf32, #tpu.memory_space<vmem>>, vector<1x8x64xf32>,
    %c0_103 = arith.constant 0 : index
    %c0_104 = arith.constant 0 : index
    %c0_105 = arith.constant 0 : index
    %126 = vector.load %arg10[%c0_103, %c0_104, %c0_105] : memref<3x64x64xf32, #tpu.memory_space<vmem>>, vector<1x64x64xf32>
    %127 = vector.shape_cast %126 : vector<1x64x64xf32> to vector<64x64xf32>
    %c1_106 = arith.constant 1 : index
    %c0_107 = arith.constant 0 : index
    %c0_108 = arith.constant 0 : index
    %128 = vector.load %arg10[%c1_106, %c0_107, %c0_108] : memref<3x64x64xf32, #tpu.memory_space<vmem>>, vector<1x64x64xf32>
    %129 = vector.shape_cast %128 : vector<1x64x64xf32> to vector<64x64xf32>
    %c2_109 = arith.constant 2 : index
    %c0_110 = arith.constant 0 : index
    %c0_111 = arith.constant 0 : index
    %130 = vector.load %arg10[%c2_109, %c0_110, %c0_111] : memref<3x64x64xf32, #tpu.memory_space<vmem>>, vector<1x64x64xf32>
    %131 = vector.shape_cast %130 : vector<1x64x64xf32> to vector<64x64xf32>
    %cst_112 = arith.constant 1.250000e-01 : f32
    %132 = vector.broadcast %cst_112 : f32 to vector<64x64xf32>
    %133 = arith.mulf %127, %132 : vector<64x64xf32>
    %134 = arith.truncf %133 : vector<64x64xf32> to vector<64x64xbf16>
    %135 = arith.truncf %129 : vector<64x64xf32> to vector<64x64xbf16>
    %cst_113 = arith.constant dense<0.000000e+00> : vector<64x64xf32>
    %136 = tpu.matmul %134, %135, %cst_113 {dimension_numbers = #tpu.dot_dimension_numbers<[1], [1], [0], [0], [0, 0, 1, 0], [], []>} : vector<64x64xbf16>, vector<64x64xbf16>, vector<64x64xf32> -> vector<64x64xf32>
    %c0_114 = arith.constant 0 : index
    %c0_115 = arith.constant 0 : index
    %137 = vector.load %arg4[%c0_114, %c0_115] : memref<64x64xf32, #tpu.memory_space<vmem>>, vector<64x64xf32>
    %138 = arith.addf %136, %137 : vector<64x64xf32>
    %cst_116 = arith.constant dense<0xFF800000> : vector<64xf32>
    %139 = vector.multi_reduction <maximumf>, %138, %cst_116 [1] : vector<64x64xf32> to vector<64xf32>
    %140 = vector.shape_cast %139 : vector<64xf32> to vector<64x1xf32>
    %141 = vector.broadcast %140 : vector<64x1xf32> to vector<64x64xf32>
    %142 = arith.subf %138, %141 : vector<64x64xf32>
    %143 = math.exp %142 : vector<64x64xf32>
    %cst_117 = arith.constant dense<0.000000e+00> : vector<64xf32>
    %144 = vector.multi_reduction <add>, %143, %cst_117 [1] : vector<64x64xf32> to vector<64xf32>
    %145 = vector.shape_cast %144 : vector<64xf32> to vector<64x1xf32>
    %146 = tpu.reciprocal %145 {approx = true} : vector<64x1xf32> -> vector<64x1xf32>
    %147 = vector.broadcast %146 : vector<64x1xf32> to vector<64x64xf32>
    %148 = arith.mulf %143, %147 : vector<64x64xf32>
    %149 = arith.truncf %148 : vector<64x64xf32> to vector<64x64xbf16>
    %150 = arith.truncf %131 : vector<64x64xf32> to vector<64x64xbf16>
    %cst_118 = arith.constant dense<0.000000e+00> : vector<64x64xf32>
    %151 = tpu.matmul %149, %150, %cst_118 {dimension_numbers = #tpu.dot_dimension_numbers<[1], [0], [0], [1], [0, 0, 1, 1], [], []>} : vector<64x64xbf16>, vector<64x64xbf16>, vector<64x64xf32> -> vector<64x64xf32>
    %cst_119 = arith.constant 0.000000e+00 : f32
    %152 = vector.broadcast %cst_119 : f32 to vector<8x32xf32>
    %153 = vector.extract_strided_slice %151 {offsets = [0, 0], sizes = [8, 64], strides = [1, 1]} : vector<64x64xf32> to vector<8x64xf32>
    %154 = arith.truncf %153 : vector<8x64xf32> to vector<8x64xbf16>
    %c0_120 = arith.constant 0 : index
    %c0_121 = arith.constant 0 : index
    %155 = vector.load %arg6[%c0_120, %c0_121] : memref<512x32xbf16, #tpu.memory_space<vmem>>, vector<64x32xbf16>
    %cst_122 = arith.constant dense<0.000000e+00> : vector<8x32xf32>
    %156 = tpu.matmul %154, %155, %cst_122 {dimension_numbers = #tpu.dot_dimension_numbers<[1], [0], [0], [1], [0, 0, 1, 1], [], []>} : vector<8x64xbf16>, vector<64x32xbf16>, vector<8x32xf32> -> vector<8x32xf32>
    %157 = arith.addf %152, %156 : vector<8x32xf32>
    %158 = vector.extract_strided_slice %151 {offsets = [8, 0], sizes = [8, 64], strides = [1, 1]} : vector<64x64xf32> to vector<8x64xf32>
    %159 = arith.truncf %158 : vector<8x64xf32> to vector<8x64xbf16>
    %c64_123 = arith.constant 64 : index
    %c0_124 = arith.constant 0 : index
    %160 = vector.load %arg6[%c64_123, %c0_124] : memref<512x32xbf16, #tpu.memory_space<vmem>>, vector<64x32xbf16>
    %cst_125 = arith.constant dense<0.000000e+00> : vector<8x32xf32>
    %161 = tpu.matmul %159, %160, %cst_125 {dimension_numbers = #tpu.dot_dimension_numbers<[1], [0], [0], [1], [0, 0, 1, 1], [], []>} : vector<8x64xbf16>, vector<64x32xbf16>, vector<8x32xf32> -> vector<8x32xf32>
    %162 = arith.addf %157, %161 : vector<8x32xf32>
    %163 = vector.extract_strided_slice %151 {offsets = [16, 0], sizes = [8, 64], strides = [1, 1]} : vector<64x64xf32> to vector<8x64xf32>
    %164 = arith.truncf %163 : vector<8x64xf32> to vector<8x64xbf16>
    %c128_126 = arith.constant 128 : index
    %c0_127 = arith.constant 0 : index
    %165 = vector.load %arg6[%c128_126, %c0_127] : memref<512x32xbf16, #tpu.memory_space<vmem>>, vector<64x32xbf16>
    %cst_128 = arith.constant dense<0.000000e+00> : vector<8x32xf32>
    %166 = tpu.matmul %164, %165, %cst_128 {dimension_numbers = #tpu.dot_dimension_numbers<[1], [0], [0], [1], [0, 0, 1, 1], [], []>} : vector<8x64xbf16>, vector<64x32xbf16>, vector<8x32xf32> -> vector<8x32xf32>
    %167 = arith.addf %162, %166 : vector<8x32xf32>
    %168 = vector.extract_strided_slice %151 {offsets = [24, 0], sizes = [8, 64], strides = [1, 1]} : vector<64x64xf32> to vector<8x64xf32>
    %169 = arith.truncf %168 : vector<8x64xf32> to vector<8x64xbf16>
    %c192_129 = arith.constant 192 : index
    %c0_130 = arith.constant 0 : index
    %170 = vector.load %arg6[%c192_129, %c0_130] : memref<512x32xbf16, #tpu.memory_space<vmem>>, vector<64x32xbf16>
    %cst_131 = arith.constant dense<0.000000e+00> : vector<8x32xf32>
    %171 = tpu.matmul %169, %170, %cst_131 {dimension_numbers = #tpu.dot_dimension_numbers<[1], [0], [0], [1], [0, 0, 1, 1], [], []>} : vector<8x64xbf16>, vector<64x32xbf16>, vector<8x32xf32> -> vector<8x32xf32>
    %172 = arith.addf %167, %171 : vector<8x32xf32>
    %173 = vector.extract_strided_slice %151 {offsets = [32, 0], sizes = [8, 64], strides = [1, 1]} : vector<64x64xf32> to vector<8x64xf32>
    %174 = arith.truncf %173 : vector<8x64xf32> to vector<8x64xbf16>
    %c256_132 = arith.constant 256 : index
    %c0_133 = arith.constant 0 : index
    %175 = vector.load %arg6[%c256_132, %c0_133] : memref<512x32xbf16, #tpu.memory_space<vmem>>, vector<64x32xbf16>
    %cst_134 = arith.constant dense<0.000000e+00> : vector<8x32xf32>
    %176 = tpu.matmul %174, %175, %cst_134 {dimension_numbers = #tpu.dot_dimension_numbers<[1], [0], [0], [1], [0, 0, 1, 1], [], []>} : vector<8x64xbf16>, vector<64x32xbf16>, vector<8x32xf32> -> vector<8x32xf32>
    %177 = arith.addf %172, %176 : vector<8x32xf32>
    %178 = vector.extract_strided_slice %151 {offsets = [40, 0], sizes = [8, 64], strides = [1, 1]} : vector<64x64xf32> to vector<8x64xf32>
    %179 = arith.truncf %178 : vector<8x64xf32> to vector<8x64xbf16>
    %c320_135 = arith.constant 320 : index
    %c0_136 = arith.constant 0 : index
    %180 = vector.load %arg6[%c320_135, %c0_136] : memref<512x32xbf16, #tpu.memory_space<vmem>>, vector<64x32xbf16>
    %cst_137 = arith.constant dense<0.000000e+00> : vector<8x32xf32>
    %181 = tpu.matmul %179, %180, %cst_137 {dimension_numbers = #tpu.dot_dimension_numbers<[1], [0], [0], [1], [0, 0, 1, 1], [], []>} : vector<8x64xbf16>, vector<64x32xbf16>, vector<8x32xf32> -> vector<8x32xf32>
    %182 = arith.addf %177, %181 : vector<8x32xf32>
    %183 = vector.extract_strided_slice %151 {offsets = [48, 0], sizes = [8, 64], strides = [1, 1]} : vector<64x64xf32> to vector<8x64xf32>
    %184 = arith.truncf %183 : vector<8x64xf32> to vector<8x64xbf16>
    %c384_138 = arith.constant 384 : index
    %c0_139 = arith.constant 0 : index
    %185 = vector.load %arg6[%c384_138, %c0_139] : memref<512x32xbf16, #tpu.memory_space<vmem>>, vector<64x32xbf16>
    %cst_140 = arith.constant dense<0.000000e+00> : vector<8x32xf32>
    %186 = tpu.matmul %184, %185, %cst_140 {dimension_numbers = #tpu.dot_dimension_numbers<[1], [0], [0], [1], [0, 0, 1, 1], [], []>} : vector<8x64xbf16>, vector<64x32xbf16>, vector<8x32xf32> -> vector<8x32xf32>
    %187 = arith.addf %182, %186 : vector<8x32xf32>
    %188 = vector.extract_strided_slice %151 {offsets = [56, 0], sizes = [8, 64], strides = [1, 1]} : vector<64x64xf32> to vector<8x64xf32>
    %189 = arith.truncf %188 : vector<8x64xf32> to vector<8x64xbf16>
    %c448_141 = arith.constant 448 : index
    %c0_142 = arith.constant 0 : index
    %190 = vector.load %arg6[%c448_141, %c0_142] : memref<512x32xbf16, #tpu.memory_space<vmem>>, vector<64x32xbf16>
    %cst_143 = arith.constant dense<0.000000e+00> : vector<8x32xf32>
    %191 = tpu.matmul %189, %190, %cst_143 {dimension_numbers = #tpu.dot_dimension_numbers<[1], [0], [0], [1], [0, 0, 1, 1], [], []>} : vector<8x64xbf16>, vector<64x32xbf16>, vector<8x32xf32> -> vector<8x32xf32>
    %192 = arith.addf %187, %191 : vector<8x32xf32>
    %c0_144 = arith.constant 0 : index
    %c0_145 = arith.constant 0 : index
    %193 = vector.load %arg7[%c0_144, %c0_145] : memref<1x32xf32, #tpu.memory_space<vmem>>, vector<1x32xf32>
    %194 = vector.broadcast %193 : vector<1x32xf32> to vector<8x32xf32>
    %195 = arith.addf %192, %194 : vector<8x32xf32>
    %c0_146 = arith.constant 0 : index
    %c0_147 = arith.constant 0 : index
    %c0_148 = arith.constant 0 : index
    %196 = vector.load %arg8[%c0_146, %c0_147, %c0_148] : memref<1x8x32xf32, #tpu.memory_space<vmem>>, vector<1x8x32xf32>
    %197 = vector.shape_cast %196 : vector<1x8x32xf32> to vector<8x32xf32>
    %198 = vector.shape_cast %195 : vector<8x32xf32> to vector<1x8x32xf32>
    tpu.vector_store %arg8[%c0_146, %c0_147, %c0_148], %198 {strides = array<i32>} : memref<1x8x32xf32, #tpu.memory_space<vmem>>, vector<1x8x32xf32>,
    return
  }
  func.func @transform_0(%arg0: i32) -> (i32, i32, i32) {
    %c0_i32 = arith.constant 0 : i32
    %c0_i32_0 = arith.constant 0 : i32
    %c0_i32_1 = arith.constant 0 : i32
    return %arg0, %c0_i32, %c0_i32_0 : i32, i32, i32
  }
  func.func @transform_1(%arg0: i32) -> (i32, i32) {
    %c0_i32 = arith.constant 0 : i32
    %c0_i32_0 = arith.constant 0 : i32
    %c0_i32_1 = arith.constant 0 : i32
    return %c0_i32, %c0_i32_0 : i32, i32
  }
  func.func @transform_2(%arg0: i32) -> (i32, i32) {
    %c0_i32 = arith.constant 0 : i32
    %c0_i32_0 = arith.constant 0 : i32
    %c0_i32_1 = arith.constant 0 : i32
    return %c0_i32, %c0_i32_0 : i32, i32
  }
  func.func @transform_3(%arg0: i32) -> (i32, i32) {
    %c0_i32 = arith.constant 0 : i32
    %c0_i32_0 = arith.constant 0 : i32
    %c0_i32_1 = arith.constant 0 : i32
    return %c0_i32, %c0_i32_0 : i32, i32
  }
  func.func @transform_4(%arg0: i32) -> (i32, i32) {
    %c0_i32 = arith.constant 0 : i32
    %c0_i32_0 = arith.constant 0 : i32
    %c0_i32_1 = arith.constant 0 : i32
    return %c0_i32, %c0_i32_0 : i32, i32
  }
  func.func @transform_5(%arg0: i32) -> (i32, i32) {
    %c0_i32 = arith.constant 0 : i32
    %c0_i32_0 = arith.constant 0 : i32
    %c0_i32_1 = arith.constant 0 : i32
    return %c0_i32, %c0_i32_0 : i32, i32
  }
  func.func @transform_6(%arg0: i32) -> (i32, i32) {
    %c0_i32 = arith.constant 0 : i32
    %c0_i32_0 = arith.constant 0 : i32
    %c0_i32_1 = arith.constant 0 : i32
    return %c0_i32, %c0_i32_0 : i32, i32
  }
  func.func @transform_7(%arg0: i32) -> (i32, i32, i32) {
    %c0_i32 = arith.constant 0 : i32
    %c0_i32_0 = arith.constant 0 : i32
    %c0_i32_1 = arith.constant 0 : i32
    return %arg0, %c0_i32, %c0_i32_0 : i32, i32, i32
  }
}

</mosaic_0001>

<bundles_post_ra>
// kernel: tpu_custom_call.1
= control target key start
LH: loop header
LB: loop body
LE: loop exit
PB: predicated region body
PF: predicated region fallthrough
CT: control target
= control target key end

     0   :  { %12 = vsyncpa [#allocation5], 0  ;;  %s2450_s0 = inlined_call_operand.vmem [shape: f32[2,8,32], index: 0, kind: input, shape index: {}]   ;;  %s2451_s1 = inlined_call_operand.vmem [shape: f32[1,32], index: 1, kind: input, shape index: {}]   ;;  %s2452_s2 = inlined_call_operand.vmem [shape: f32[1,32], index: 2, kind: input, shape index: {}]   ;;  %s2453_s3 = inlined_call_operand.vmem [shape: f32[64,64], index: 3, kind: input, shape index: {}]   ;;  %s2454_s4 = inlined_call_operand.vmem [shape: bf16[32,1536], index: 4, kind: input, shape index: {}]   ;;  %s2455_s5 = inlined_call_operand.vmem [shape: bf16[512,32], index: 5, kind: input, shape index: {}]   ;;  %s2456_s6 = inlined_call_operand.vmem [shape: f32[1,32], index: 6, kind: input, shape index: {}]   ;;  %s2457_s7 = inlined_call_operand.hbm [shape: f32[2,8,32], index: 7, kind: output, shape index: {}]  }
   0x1   :  { %14 = vsyncpa [#allocation5 + $0x1], 0  ;;  %s1952_s24 = smov 0   ;;  %s1954_s25 = smov 0  }
   0x2   :  { %s1956_s26 = smov 0   ;;  %s1958_s27 = smov 0  }
   0x3 LB: > { %s1973_s28 = sadd.s32 4294967295, %s1908_s27   ;;  %s1448_s29 = sadd.s32 4294967294, %s1908_s27   ;;  %s1908_s27 = sphi %s1958_s27, %s2463_s27   ;;  %s1904_s26 = sphi %s1956_s26, %s2462_s26   ;;  %s1900_s25 = sphi %s1954_s25, %s2461_s25   ;;  %s1896_s24 = sphi %s1952_s24, %s2460_s24  }
   0x4   : > { %s1977_s30 = sadd.s32 1, %s1908_s27   ;;  %s179_s8 = sadd.s32 1, %s1904_s26 }
   0x5   : > { %s176_s9 = ssub.s32 %s1908_s27, %s1977_s30  ;;  %p189_p0 = scmp.ne.s32.totalorder %s1904_s26, %s1900_s25 }
   0x6   : > { %p177_p1 = scmp.eq.s32.totalorder %s176_s9, 0  ;;  %p190_p2 = scmp.eq.s32.totalorder %s1973_s28, 1 }
   0x7   : > { %p195_p3 = scmp.ne.s32.totalorder %s1900_s25, %s1896_s24  ;;  %p196_p4 = scmp.eq.s32.totalorder %s1448_s29, 1 }
   0x8   : > { %s1988_s10 = scalar_select %p177_p1, %s1904_s26, %s179_s8  }
   0x9   : > { %p1990_p5 = por %p190_p2, %p189_p0  ;;  %p1994_p6 = por %p196_p4, %p195_p3 }
   0xa   : > { %p1451_p7 = scmp.ge.s32.totalorder %s1908_s27, 1  ;;  %p239_p8 = scmp.lt.s32.totalorder %s1908_s27, 3 }
   0xc   : > { %p240_p9 = pnand %p1451_p7, %p239_p8 }
   0xd   : > { %p270_p10 = scmp.lt.s32.totalorder (!%p240_p9), %s1973_s28, 1  ;;  %s1911_s20 = smov (!%p240_p9), 64  }
   0xe   : > { %243 = sbr.rel (%p240_p9) target bundleno = 1357 (0x54d), region = 48  ;;  %s1707_s19 = sshll.u32 (!%p240_p9), %s1973_s28, 3 }
   0xf   : > { %s1384_s23 = scalar_lea.hbm (!%p240_p9), %s2457_s7, %s1707_s19 }
  0x13   : > { %s271_s13 = scalar_select %p270_p10, %s1973_s28, 1  ;;  %vm276_vm0 = vcmask 261120   ;;  %v1910_v2 = vmov 32.0   ;;  %v1504_v14 = vld [vmem:[%s2454_s4 + $0x60] sm:$0xf]  ;;  %vm633_vm5 = vcmask 523264  }
  0x14   : > { %1810 = vrcp.f32 %v1910_v2  ;;  %v1728_v15 = vld [vmem:[%s2454_s4 + $0x8c] sm:$0xf0]  ;;  %v1722_v16 = vld [vmem:[%s2454_s4 + $0x64] sm:$0xf]  ;;  %v1506_v18 = vld [vmem:[%s2454_s4 + $0x90] sm:$0xf0] }
  0x15   : > { %s1453_s14 = sshll.u32 %s271_s13, 3  ;;  %v1505_v17 = vor.u32 %v1728_v15, %v1504_v14  ;;  %v1512_v19 = vld [vmem:[%s2454_s4 + $0x68] sm:$0xf]  ;;  %v1729_v20 = vld [vmem:[%s2454_s4 + $0x94] sm:$0xf0]  ;;  %v1509_v21 = vor.u32 %v1722_v16, %v1506_v18  ;;  %s1388_s13 = sshll.u32 %s1384_s23, 4  ;;  %s1389_s13 = int_to_ptr.hbm [resolvable:$true] %s1388_s13 }
  0x16   : > { %s273_s17 = scalar_lea.vmem %s2450_s0, %s1453_s14  ;;  %v1513_v22 = vor.u32 %v1729_v20, %v1512_v19  ;;  %v1723_v23 = vld [vmem:[%s2454_s4 + $0x6c] sm:$0xf]  ;;  %v1514_v24 = vld [vmem:[%s2454_s4 + $0x98] sm:$0xf0]  ;;  %v1456_v26 = vld [vmem:[%s2454_s4] sm:$0xf] }
  0x17   : > { %v275_v0 = vld [vmem:[%s273_s17] sm:$0xff]  ;;  %470 = vmatpush.bf16.msra.mxu0 %v1505_v17  ;;  %v1517_v25 = vor.u32 %v1723_v23, %v1514_v24  ;;  %483 = vmatpush.bf16.msra.mxu1 %v1509_v21  ;;  %v1716_v27 = vld [vmem:[%s2454_s4 + $0x2c] sm:$0xf0]  ;;  %v1458_v30 = vld [vmem:[%s2454_s4 + $0x30] sm:$0xf0]  ;;  %s267_s17 = sand.u32 1, %s1900_s25  }
  0x18   : > { %v277_v1 = vsel %vm276_vm0, %v275_v0, 0.0  ;;  %496 = vmatpush.bf16.msra.mxu2 %v1513_v22  ;;  %v1710_v28 = vld [vmem:[%s2454_s4 + $0x4] sm:$0xf]  ;;  %v1457_v29 = vor.u32 %v1716_v27, %v1456_v26  ;;  %v1464_v31 = vld [vmem:[%s2454_s4 + $0x8] sm:$0xf]  ;;  %s1452_s18 = sshll.u32 %s267_s17, 3 }
  0x19   : > { %278 = vadd.xlane.f32.xlu0 %v277_v1  ;;  %509 = vmatpush.bf16.msra.mxu3 %v1517_v25  ;;  %v1717_v32 = vld [vmem:[%s2454_s4 + $0x34] sm:$0xf0]  ;;  %v1461_v33 = vor.u32 %v1710_v28, %v1458_v30  ;;  %v1711_v35 = vld [vmem:[%s2454_s4 + $0xc] sm:$0xf]  ;;  %v1466_v36 = vld [vmem:[%s2454_s4 + $0x38] sm:$0xf0] }
  0x1a   : > { %v1811_v3 = vpop.eup %1810  ;;  %v1465_v34 = vor.u32 %v1717_v32, %v1464_v31  ;;  %v1469_v37 = vor.u32 %v1711_v35, %v1466_v36  ;;  %v1725_v39 = vld [vmem:[%s2454_s4 + $0x7c] sm:$0xf]  ;;  %v1530_v40 = vld [vmem:[%s2454_s4 + $0xa8] sm:$0xf0]  ;;  %v1528_v41 = vld [vmem:[%s2454_s4 + $0x78] sm:$0xf] }
  0x1b   : > { %v281_v4 = vmul.f32 32.0, %v1811_v3  ;;  %vm285_vm1 = vweird.f32 %v1811_v3  ;;  %471 = vmatpush.bf16.msra.mxu0 %v1457_v29  ;;  %484 = vmatpush.bf16.msra.mxu1 %v1461_v33  ;;  %v1533_v43 = vor.u32 %v1725_v39, %v1530_v40  ;;  %v1731_v44 = vld [vmem:[%s2454_s4 + $0xa4] sm:$0xf0]  ;;  %v1713_v45 = vld [vmem:[%s2454_s4 + $0x1c] sm:$0xf]  ;;  %s269_s8 = scalar_lea.vmem [#allocation4], %s1452_s18 }
  0x1c   : > { %497 = vmatpush.bf16.msra.mxu2 %v1465_v34  ;;  %v1482_v46 = vld [vmem:[%s2454_s4 + $0x48] sm:$0xf0]  ;;  %v1529_v47 = vor.u32 %v1731_v44, %v1528_v41  ;;  %v1520_v48 = vld [vmem:[%s2454_s4 + $0x70] sm:$0xf]  ;;  %v1730_v49 = vld [vmem:[%s2454_s4 + $0x9c] sm:$0xf0] }
  0x1d   : > { %v282_v5 = vsub.f32 1.0, %v281_v4  ;;  %510 = vmatpush.bf16.msra.mxu3 %v1469_v37  ;;  %v1724_v50 = vld [vmem:[%s2454_s4 + $0x74] sm:$0xf]  ;;  %v1485_v52 = vor.u32 %v1713_v45, %v1482_v46  ;;  %v1521_v53 = vor.u32 %v1730_v49, %v1520_v48  ;;  %v1522_v54 = vld [vmem:[%s2454_s4 + $0xa0] sm:$0xf0]  ;;  %s1386_s9 = sshll.u32 %s269_s8, 4  ;;  %s1387_s9 = int_to_ptr.vmem [resolvable:$true] %s1386_s9 }
  0x1e   : > { %v1472_v55 = vld [vmem:[%s2454_s4 + $0x10] sm:$0xf]  ;;  %v1525_v56 = vor.u32 %v1724_v50, %v1522_v54  ;;  %v1718_v57 = vld [vmem:[%s2454_s4 + $0x3c] sm:$0xf0]  ;;  %v1712_v58 = vld [vmem:[%s2454_s4 + $0x14] sm:$0xf] }
  0x1f   : > { %v283_v6 = vmul.f32 %v1811_v3, %v282_v5  ;;  %v1474_v59 = vld [vmem:[%s2454_s4 + $0x40] sm:$0xf0]  ;;  %522 = vmatpush.bf16.msrb.mxu0 %v1521_v53  ;;  %v1473_v60 = vor.u32 %v1718_v57, %v1472_v55  ;;  %v1480_v61 = vld [vmem:[%s2454_s4 + $0x18] sm:$0xf]  ;;  %v1719_v62 = vld [vmem:[%s2454_s4 + $0x44] sm:$0xf0] }
  0x20   : > { %548 = vmatpush.bf16.msrb.mxu2 %v1529_v47  ;;  %535 = vmatpush.bf16.msrb.mxu1 %v1525_v56  ;;  %v1477_v63 = vor.u32 %v1712_v58, %v1474_v59  ;;  %v1732_v14 = vld [vmem:[%s2454_s4 + $0xac] sm:$0xf0]  ;;  %v1726_v15 = vld [vmem:[%s2454_s4 + $0x84] sm:$0xf]  ;;  %v1538_v16 = vld [vmem:[%s2454_s4 + $0xb0] sm:$0xf0] }
  0x21   : > { %v284_v7 = vadd.f32 %v1811_v3, %v283_v6  ;;  %561 = vmatpush.bf16.msrb.mxu3 %v1533_v43  ;;  %v1733_v18 = vld [vmem:[%s2454_s4 + $0xb4] sm:$0xf0]  ;;  %v1727_v19 = vld [vmem:[%s2454_s4 + $0x8c] sm:$0xf]  ;;  %v1546_v20 = vld [vmem:[%s2454_s4 + $0xb8] sm:$0xf0]  ;;  %v1541_v23 = vor.u32 %v1726_v15, %v1538_v16 }
  0x22   : > { %v1488_v24 = vld [vmem:[%s2454_s4 + $0x20] sm:$0xf]  ;;  %v1720_v25 = vld [vmem:[%s2454_s4 + $0x4c] sm:$0xf0]  ;;  %v1549_v27 = vor.u32 %v1727_v19, %v1546_v20  ;;  %v1714_v28 = vld [vmem:[%s2454_s4 + $0x24] sm:$0xf] }
  0x23   : > { %v286_v8 = vsel %vm285_vm1, %v1811_v3, %v284_v7  ;;  %523 = vmatpush.bf16.msrb.mxu0 %v1473_v60  ;;  %v1807_v7 = vld [vmem:[%s2451_s1] ss:$0 sm:$0xff]  ;;  %v1490_v29 = vld [vmem:[%s2454_s4 + $0x50] sm:$0xf0]  ;;  %v1496_v30 = vld [vmem:[%s2454_s4 + $0x28] sm:$0xf]  ;;  %v1489_v34 = vor.u32 %v1720_v25, %v1488_v24 }
  0x24   : > { %536 = vmatpush.bf16.msrb.mxu1 %v1477_v63  ;;  %v1721_v31 = vld [vmem:[%s2454_s4 + $0x54] sm:$0xf0]  ;;  %v1715_v32 = vld [vmem:[%s2454_s4 + $0x2c] sm:$0xf]  ;;  %v1498_v33 = vld [vmem:[%s2454_s4 + $0x58] sm:$0xf0]  ;;  %v1493_v35 = vor.u32 %v1714_v28, %v1490_v29 }
  0x25   : > { %562 = vmatpush.bf16.msrb.mxu3 %v1485_v52  ;;  %v1497_v36 = vor.u32 %v1721_v31, %v1496_v30  ;;  %v1501_v37 = vor.u32 %v1715_v32, %v1498_v33  ;;  %s1374_s28 = scalar_lea.sflag [#allocation5], %s267_s17  ;;  %s1860_s14 = sshra.s32 %s1389_s13, 4  ;;  %s1861_s14 = int_to_ptr.hbm [resolvable:$true] %s1860_s14 }
  0x26   : > { %s1862_s15 = scalar_lea.hbm %s1861_s14, 8  ;;  %s1866_s18 = scalar_lea.hbm %s2457_s7, 16 }
  0x27   : > { %p1863_p11 = scmp.ne.s32.totalorder %s1861_s14, %s1862_s15  ;;  %p1867_p0 = scmp.lt.s32.totalorder %s1861_s14, %s2457_s7 }
  0x28   : > { %p1868_p1 = scmp.lt.s32.totalorder %s1866_s18, %s1862_s15 }
  0x29   : > { %p1864_p12 = pnand %p1863_p11, %p1990_p5 }
  0x2a   : > { %p1869_p2 = por %p1868_p1, %p1867_p0 }
  0x2b   : > { %p1865_p13 = pneg %p1864_p12 }
  0x2d   : > { %p1870_p3 = pnand %p1869_p2, %p1865_p13 }
  0x8c   : > { %v279_v9 = vpop.xlane.xlu0 %278 }
  0x8d   : > { %v287_v10 = vmul.f32 %v286_v8, %v279_v9  ;;  %v1808_v9 = vld [vmem:[%s2452_s2] ss:$0 sm:$0xff] }
  0x8f   : > { %v2006_v11 = vsub.f32 %v275_v0, %v287_v10  ;;  %v1481_v0 = vor.u32 %v1719_v62, %v1480_v61 }
  0x91   : > { %v289_v12 = vmul.f32 %v2006_v11, %v2006_v11  ;;  %549 = vmatpush.bf16.msrb.mxu2 %v1481_v0 }
  0x93   : > { %v290_v13 = vsel %vm276_vm0, %v289_v12, 0.0 }
  0x94   : > { %291 = vadd.xlane.f32.xlu0 %v290_v13  ;;  %v1536_v13 = vld [vmem:[%s2454_s4 + $0x80] sm:$0xf] }
  0x95   : > { %v1537_v22 = vor.u32 %v1732_v14, %v1536_v13 }
 0x107   : > { %v292_v38 = vpop.xlane.xlu0 %291 }
 0x108   : > { %v293_v42 = vmul.f32 %v292_v38, %v286_v8 }
 0x10a   : > { %v294_v51 = vadd.f32 1e-05, %v293_v42 }
 0x10c   : > { %1812 = vrsqrt.f32 %v294_v51  ;;  %vm301_vm3 = vweird.f32 %v294_v51 }
 0x112   : > { %v1813_v1 = vpop.eup %1812 }
 0x113   : > { %v296_v2 = vmul.f32 %v1813_v1, %v294_v51  ;;  %vm302_vm2 = vweird.f32 %v1813_v1 }
 0x114   : > { %vm303_vm4 = vmor %vm301_vm3, %vm302_vm2 }
 0x115   : > { %v297_v3 = vmul.f32 %v1813_v1, %v296_v2 }
 0x117   : > { %v298_v4 = vmul.f32 0.5, %v297_v3 }
 0x119   : > { %v299_v5 = vsub.f32 1.5, %v298_v4 }
 0x11b   : > { %v300_v6 = vmul.f32 %v1813_v1, %v299_v5 }
 0x11d   : > { %v304_v8 = vsel %vm303_vm4, %v1813_v1, %v300_v6 }
 0x11e   : > { %v305_v10 = vmul.f32 %v304_v8, %v2006_v11  ;;  %v1544_v11 = vld [vmem:[%s2454_s4 + $0x88] sm:$0xf] }
 0x11f   : > { %v1545_v26 = vor.u32 %v1733_v18, %v1544_v11 }
 0x120   : > { %v310_v12 = vmul.f32 %v1807_v7, %v305_v10 }
 0x122   : > { %v315_v17 = vadd.f32 %v1808_v9, %v310_v12 }
 0x124   : > { %v316_v21 = vpack.c.bf16 %v315_v17, %v315_v17 }
 0x126   : > { %1550 = vmatmul.msk.bf16.vlgmr.msra.gmra.mxu0 %vm276_vm0, %v316_v21  ;;  %1551 = vmatmul.msk.bf16.vlgmr.msra.gmra.mxu1 %vm276_vm0, %v316_v21 }
 0x127   : > { %1552 = vmatmul.msk.bf16.vlgmr.msra.gmra.mxu2 %vm276_vm0, %v316_v21  ;;  %1553 = vmatmul.msk.bf16.vlgmr.msra.gmra.mxu3 %vm276_vm0, %v316_v21 }
 0x128   : > { %574 = vmatpush.bf16.msra.mxu0 %v1537_v22  ;;  %587 = vmatpush.bf16.msra.mxu1 %v1541_v23 }
 0x129   : > { %600 = vmatpush.bf16.msra.mxu2 %v1545_v26  ;;  %613 = vmatpush.bf16.msra.mxu3 %v1549_v27 }
 0x12c   : > { %575 = vmatpush.bf16.msra.mxu0 %v1489_v34  ;;  %588 = vmatpush.bf16.msra.mxu1 %v1493_v35 }
 0x12d   : > { %601 = vmatpush.bf16.msra.mxu2 %v1497_v36  ;;  %614 = vmatpush.bf16.msra.mxu3 %v1501_v37 }
 0x136   : > { %1554 = vmatmul.msk.bf16.vlgmr.msrb.gmra.mxu0 %vm276_vm0, %v316_v21  ;;  %1555 = vmatmul.msk.bf16.vlgmr.msrb.gmra.mxu1 %vm276_vm0, %v316_v21 }
 0x137   : > { %1556 = vmatmul.msk.bf16.vlgmr.msrb.gmra.mxu2 %vm276_vm0, %v316_v21  ;;  %1557 = vmatmul.msk.bf16.vlgmr.msrb.gmra.mxu3 %vm276_vm0, %v316_v21 }
 0x146   : > { %1558 = vmatmul.msk.bf16.vlgmr.msra.gmra.mxu0 %vm276_vm0, %v316_v21  ;;  %1559 = vmatmul.msk.bf16.vlgmr.msra.gmra.mxu1 %vm276_vm0, %v316_v21 }
 0x147   : > { %1560 = vmatmul.msk.bf16.vlgmr.msra.gmra.mxu2 %vm276_vm0, %v316_v21  ;;  %1561 = vmatmul.msk.bf16.vlgmr.msra.gmra.mxu3 %vm276_vm0, %v316_v21 }
 0x1a3   : > { %v473_v38 = vpop.f32.mrf.mxu0  ;;  %v486_v39 = vpop.f32.mrf.mxu1 }
 0x1a4   : > { %634 = vst.msk [vmem:[#allocation3] sm:$0xff] %vm633_vm5, %v473_v38  ;;  %637 = vrot.lane.b32.xlu0 %v473_v38, %s1911_s20 }
 0x1a5   : > { %642 = vst.msk [vmem:[#allocation3 + $0x10] sm:$0xff] %vm633_vm5, %v486_v39 }
 0x1aa   : > { %v499_v40 = vpop.f32.mrf.mxu2  ;;  %v512_v41 = vpop.f32.mrf.mxu3 }
 0x1ab   : > { %650 = vst.msk [vmem:[#allocation3 + $0x20] sm:$0xff] %vm633_vm5, %v499_v40  ;;  %v475_v42 = vpop.f32.mrf.mxu0  ;;  %v488_v43 = vpop.f32.mrf.mxu1  ;;  %v731_v23 = vld [vmem:[#allocation3] sm:$0xff] }
 0x1ac   : > { %658 = vst.msk [vmem:[#allocation3 + $0x30] sm:$0xff] %vm633_vm5, %v512_v41  ;;  %v755_v25 = vmul.f32 0.125, %v731_v23  ;;  %v733_v28 = vld [vmem:[#allocation3 + $0x10] sm:$0xff]  ;;  %v771_v42 = vld [vmem:[%s2453_s3] sm:$0xff] }
 0x1ad   : > { %v757_v30 = vmul.f32 0.125, %v733_v28 }
 0x1b2   : > { %v501_v44 = vpop.f32.mrf.mxu2  ;;  %v514_v45 = vpop.f32.mrf.mxu3  ;;  %v735_v33 = vld [vmem:[#allocation3 + $0x20] sm:$0xff] }
 0x1b3   : > { %v525_v46 = vpop.f32.mrf.mxu0  ;;  %v538_v47 = vpop.f32.mrf.mxu1  ;;  %v759_v35 = vmul.f32 0.125, %v735_v33  ;;  %v737_v38 = vld [vmem:[#allocation3 + $0x30] sm:$0xff] }
 0x1b4   : > { %667 = vst.msk [vmem:[#allocation3 + $0x40] sm:$0xff] %vm633_vm5, %v525_v46  ;;  %678 = vrot.lane.b32.xlu2 %v538_v47, %s1911_s20 }
 0x1b5   : > { %675 = vst.msk [vmem:[#allocation3 + $0x50] sm:$0xff] %vm633_vm5, %v538_v47 }
 0x1ba   : > { %v551_v48 = vpop.f32.mrf.mxu2  ;;  %v564_v49 = vpop.f32.mrf.mxu3 }
 0x1bb   : > { %683 = vst.msk [vmem:[#allocation3 + $0x60] sm:$0xff] %vm633_vm5, %v551_v48  ;;  %694 = vrot.lane.b32.xlu1 %v564_v49, %s1911_s20  ;;  %v527_v50 = vpop.f32.mrf.mxu0  ;;  %v540_v51 = vpop.f32.mrf.mxu1  ;;  %v739_v19 = vld [vmem:[#allocation3 + $0x40] sm:$0xff] }
 0x1bc   : > { %691 = vst.msk [vmem:[#allocation3 + $0x70] sm:$0xff] %vm633_vm5, %v564_v49  ;;  %670 = vrot.lane.b32.xlu2 %v525_v46, %s1911_s20  ;;  %v741_v15 = vld [vmem:[#allocation3 + $0x50] sm:$0xff]  ;;  %v772_v46 = vld [vmem:[%s2453_s3 + $0x8] sm:$0xff] }
 0x1bd   : > { %v773_v50 = vld [vmem:[%s2453_s3 + $0x10] sm:$0xff] }
 0x1c2   : > { %v553_v52 = vpop.f32.mrf.mxu2  ;;  %v566_v53 = vpop.f32.mrf.mxu3  ;;  %v743_v9 = vld [vmem:[#allocation3 + $0x60] sm:$0xff] }
 0x1c3   : > { %686 = vrot.lane.b32.xlu1 %v551_v48, %s1911_s20  ;;  %v2187_v54 = vpop.f32.mrf.mxu0  ;;  %v2189_v55 = vpop.f32.mrf.mxu1  ;;  %v745_v4 = vld [vmem:[#allocation3 + $0x70] sm:$0xff] }
 0x1c4   : > { %700 = vst.msk [vmem:[#allocation3 + $0x80] sm:$0xff] %vm633_vm5, %v2187_v54  ;;  %653 = vrot.lane.b32.xlu2 %v499_v40, %s1911_s20  ;;  %v761_v40 = vmul.f32 0.125, %v737_v38 }
 0x1c5   : > { %708 = vst.msk [vmem:[#allocation3 + $0x90] sm:$0xff] %vm633_vm5, %v2189_v55 }
 0x1ca   : > { %v2196_v56 = vpop.f32.mrf.mxu2  ;;  %v2198_v57 = vpop.f32.mrf.mxu3 }
 0x1cb   : > { %716 = vst.msk [vmem:[#allocation3 + $0xa0] sm:$0xff] %vm633_vm5, %v2196_v56  ;;  %645 = vrot.lane.b32.xlu1 %v486_v39, %s1911_s20  ;;  %v579_v58 = vpop.f32.mrf.mxu0  ;;  %v592_v59 = vpop.f32.mrf.mxu1 }
 0x1cc   : > { %724 = vst.msk [vmem:[#allocation3 + $0xb0] sm:$0xff] %vm633_vm5, %v2198_v57  ;;  %v774_v58 = vld [vmem:[%s2453_s3 + $0x18] sm:$0xff] }
 0x1d2   : > { %v605_v60 = vpop.f32.mrf.mxu2  ;;  %v618_v61 = vpop.f32.mrf.mxu3 }
 0x1d3   : > { %661 = vrot.lane.b32.xlu1 %v512_v41, %s1911_s20 }
 0x20e   : > { %v679_v62 = vpop.permute.xlu2 %678 }
 0x20f   : > { %681 = vst.msk [vmem:[#allocation3 + $0x58] sm:$0xff] %vm633_vm5, %v679_v62  ;;  %v775_v62 = vld [vmem:[%s2453_s3 + $0x20] sm:$0xff] }
 0x216   : > { %v638_v63 = vpop.permute.xlu0 %637  ;;  %v671_v0 = vpop.permute.xlu2 %670  ;;  %v742_v14 = vld [vmem:[#allocation3 + $0x58] sm:$0xff] }
 0x217   : > { %640 = vst.msk [vmem:[#allocation3 + $0x8] sm:$0xff] %vm633_vm5, %v638_v63  ;;  %v768_v16 = vpack.c.bf16 %v742_v14, %v741_v15 }
 0x218   : > { %673 = vst.msk [vmem:[#allocation3 + $0x48] sm:$0xff] %vm633_vm5, %v671_v0 }
 0x219   : > { %v795_v17 = vsel %vm633_vm5, %v768_v16, 0 }
 0x21e   : > { %v654_v1 = vpop.permute.xlu2 %653  ;;  %v732_v21 = vld [vmem:[#allocation3 + $0x8] sm:$0xff] }
 0x21f   : > { %656 = vst.msk [vmem:[#allocation3 + $0x28] sm:$0xff] %vm633_vm5, %v654_v1  ;;  %v740_v18 = vld [vmem:[#allocation3 + $0x48] sm:$0xff]  ;;  %v756_v24 = vmul.f32 0.125, %v732_v21 }
 0x220   : > { %v767_v20 = vpack.c.bf16 %v740_v18, %v739_v19 }
 0x221   : > { %v763_v26 = vpack.c.bf16 %v756_v24, %v755_v25 }
 0x222   : > { %v792_v22 = vsel %vm633_vm5, %v767_v20, 0 }
 0x226   : > { %v736_v32 = vld [vmem:[#allocation3 + $0x28] sm:$0xff] }
 0x227   : > { %v760_v34 = vmul.f32 0.125, %v736_v32 }
 0x229   : > { %v765_v36 = vpack.c.bf16 %v760_v34, %v759_v35 }
 0x22d   : > { %v695_v2 = vpop.permute.xlu1 %694 }
 0x22e   : > { %697 = vst.msk [vmem:[#allocation3 + $0x78] sm:$0xff] %vm633_vm5, %v695_v2 }
 0x235   : > { %v687_v3 = vpop.permute.xlu1 %686  ;;  %v746_v5 = vld [vmem:[#allocation3 + $0x78] sm:$0xff] }
 0x236   : > { %689 = vst.msk [vmem:[#allocation3 + $0x68] sm:$0xff] %vm633_vm5, %v687_v3  ;;  %v770_v6 = vpack.c.bf16 %v746_v5, %v745_v4  ;;  %v776_v3 = vld [vmem:[%s2453_s3 + $0x28] sm:$0xff]  ;;  %v777_v5 = vld [vmem:[%s2453_s3 + $0x30] sm:$0xff] }
 0x238   : > { %v801_v7 = vsel %vm633_vm5, %v770_v6, 0 }
 0x239   : > { %807 = vmatpush.bf16.xpose.msrb.mxu0 %v801_v7 }
 0x23d   : > { %v646_v8 = vpop.permute.xlu1 %645  ;;  %v744_v10 = vld [vmem:[#allocation3 + $0x68] sm:$0xff] }
 0x23e   : > { %648 = vst.msk [vmem:[#allocation3 + $0x18] sm:$0xff] %vm633_vm5, %v646_v8  ;;  %v769_v12 = vpack.c.bf16 %v744_v10, %v743_v9 }
 0x240   : > { %v798_v13 = vsel %vm633_vm5, %v769_v12, 0 }
 0x241   : > { %808 = vmatpush.bf16.xpose.msrb.mxu0 %v798_v13 }
 0x245   : > { %v662_v11 = vpop.permute.xlu1 %661  ;;  %v734_v27 = vld [vmem:[#allocation3 + $0x18] sm:$0xff] }
 0x246   : > { %664 = vst.msk [vmem:[#allocation3 + $0x38] sm:$0xff] %vm633_vm5, %v662_v11  ;;  %v758_v29 = vmul.f32 0.125, %v734_v27 }
 0x248   : > { %v764_v31 = vpack.c.bf16 %v758_v29, %v757_v30 }
 0x249   : > { %809 = vmatpush.bf16.xpose.msrb.mxu0 %v795_v17 }
 0x24d   : > { %v738_v37 = vld [vmem:[#allocation3 + $0x38] sm:$0xff] }
 0x24e   : > { %v762_v39 = vmul.f32 0.125, %v738_v37  ;;  %v753_v37 = vld [vmem:[#allocation3 + $0xb0] sm:$0xff] }
 0x250   : > { %v766_v41 = vpack.c.bf16 %v762_v39, %v761_v40 }
 0x251   : > { %810 = vmatpush.bf16.xpose.msrb.mxu0 %v792_v22 }
 0x258   : > { %1562 = vmatmul.msk.bf16.vlgmr.msrb.gmra.mxu0 %vm633_vm5, %v763_v26 }
 0x268   : > { %1563 = vmatmul.msk.bf16.gmra.mxu0 %vm633_vm5, %v764_v31 }
 0x278   : > { %1564 = vmatmul.msk.bf16.gmra.mxu0 %vm633_vm5, %v765_v36 }
 0x288   : > { %1565 = vmatmul.msk.bf16.gmra.mxu0 %vm633_vm5, %v766_v41  ;;  %v751_v41 = vld [vmem:[#allocation3 + $0xa0] sm:$0xff] }
 0x2d5   : > { %v812_v43 = vpop.f32.mrf.mxu0 }
 0x2d6   : > { %v813_v44 = vadd.f32 %v812_v43, %v771_v42 }
 0x2d8   : > { %v832_v45 = vsel %vm633_vm5, %v813_v44, -inf }
 0x2d9   : > { %833 = vmax.xlane.f32.xlu2 %v832_v45  ;;  %v749_v45 = vld [vmem:[#allocation3 + $0x90] sm:$0xff] }
 0x2dd   : > { %v814_v47 = vpop.f32.mrf.mxu0 }
 0x2de   : > { %v815_v48 = vadd.f32 %v814_v47, %v772_v46 }
 0x2e0   : > { %v835_v49 = vsel %vm633_vm5, %v815_v48, -inf }
 0x2e1   : > { %836 = vmax.xlane.f32.xlu1 %v835_v49 }
 0x2e5   : > { %v817_v51 = vpop.f32.mrf.mxu0 }
 0x2e6   : > { %v818_v52 = vadd.f32 %v817_v51, %v773_v50 }
 0x2e8   : > { %v838_v53 = vsel %vm633_vm5, %v818_v52, -inf }
 0x2e9   : > { %839 = vmax.xlane.f32.xlu0 %v838_v53 }
 0x2ed   : > { %v819_v59 = vpop.f32.mrf.mxu0 }
 0x2ee   : > { %v820_v60 = vadd.f32 %v819_v59, %v774_v58 }
 0x2f0   : > { %v841_v61 = vsel %vm633_vm5, %v820_v60, -inf }
 0x2f1   : > { %842 = vmax.xlane.f32.xlu2 %v841_v61 }
 0x2f5   : > { %v822_v63 = vpop.f32.mrf.mxu0 }
 0x2f6   : > { %v823_v0 = vadd.f32 %v822_v63, %v775_v62 }
 0x2f8   : > { %v844_v1 = vsel %vm633_vm5, %v823_v0, -inf }
 0x2f9   : > { %845 = vmax.xlane.f32.xlu2 %v844_v1  ;;  %v747_v1 = vld [vmem:[#allocation3 + $0x80] sm:$0xff] }
 0x2fa   : > { %711 = vrot.lane.b32.xlu1 %v2189_v55, %s1911_s20 }
 0x2fd   : > { %727 = vrot.lane.b32.xlu0 %v2198_v57, %s1911_s20  ;;  %v824_v2 = vpop.f32.mrf.mxu0  ;;  %v778_v57 = vld [vmem:[%s2453_s3 + $0x38] sm:$0xff] }
 0x2fe   : > { %v2251_v4 = vadd.f32 %v824_v2, %v776_v3 }
 0x300   : > { %v847_v55 = vsel %vm633_vm5, %v2251_v4, -inf }
 0x305   : > { %v827_v6 = vpop.f32.mrf.mxu0 }
 0x306   : > { %v2256_v7 = vadd.f32 %v827_v6, %v777_v5 }
 0x30d   : > { %v829_v8 = vpop.f32.mrf.mxu0 }
 0x30e   : > { %v2265_v9 = vadd.f32 %v829_v8, %v778_v57 }
 0x310   : > { %v853_v10 = vsel %vm633_vm5, %v2265_v9, -inf }
 0x311   : > { %719 = vrot.lane.b32.xlu2 %v2196_v56, %s1911_s20  ;;  %v850_v56 = vsel %vm633_vm5, %v2256_v7, -inf }
 0x324   : > { %848 = vmax.xlane.f32.xlu1 %v847_v55 }
 0x327   : > { %851 = vmax.xlane.f32.xlu0 %v850_v56 }
 0x33a   : > { %854 = vmax.xlane.f32.xlu2 %v853_v10 }
 0x33d   : > { %703 = vrot.lane.b32.xlu1 %v2187_v54, %s1911_s20 }
 0x34c   : > { %v834_v12 = vpop.xlane.xlu2 %833 }
 0x34d   : > { %v856_v14 = vsub.f32 %v813_v44, %v834_v12 }
 0x34f   : > { %v864_v11 = vmul.f32 1.442695, %v856_v14 }
 0x354   : > { %v837_v13 = vpop.xlane.xlu1 %836 }
 0x355   : > { %v857_v15 = vsub.f32 %v815_v48, %v837_v13 }
 0x357   : > { %v866_v16 = vmul.f32 1.442695, %v857_v15 }
 0x359   : > { %1814 = vpow2.f32 %v866_v16 }
 0x35a   : > { %1816 = vpow2.f32 %v864_v11 }
 0x35c   : > { %v840_v17 = vpop.xlane.xlu0 %839 }
 0x35d   : > { %v858_v18 = vsub.f32 %v818_v52, %v840_v17 }
 0x35f   : > { %v2271_v19 = vpop.eup %1814  ;;  %v868_v20 = vmul.f32 1.442695, %v858_v18 }
 0x360   : > { %v883_v21 = vsel %vm633_vm5, %v2271_v19, 0.0  ;;  %v2275_v22 = vpop.eup %1816 }
 0x361   : > { %1818 = vpow2.f32 %v868_v20  ;;  %884 = vadd.xlane.f32.xlu0 %v883_v21  ;;  %v880_v24 = vsel %vm633_vm5, %v2275_v22, 0.0  ;;  %v1741_v20 = vld [vmem:[%s2455_s5 + $0x38] sm:$0xff]  ;;  %v1736_v21 = vld [vmem:[%s2455_s5 + $0x10] sm:$0xff] }
 0x362   : > { %1018 = vmatpush.bf16.msrb.mxu2 %v1741_v20 }
 0x364   : > { %v843_v54 = vpop.xlane.xlu2 %842 }
 0x365   : > { %v859_v23 = vsub.f32 %v820_v60, %v843_v54 }
 0x367   : > { %v2279_v25 = vpop.eup %1818  ;;  %v870_v26 = vmul.f32 1.442695, %v859_v23  ;;  %881 = vadd.xlane.f32.xlu1 %v880_v24 }
 0x368   : > { %v886_v27 = vsel %vm633_vm5, %v2279_v25, 0.0 }
 0x369   : > { %1820 = vpow2.f32 %v870_v26  ;;  %887 = vadd.xlane.f32.xlu2 %v886_v27 }
 0x36c   : > { %v712_v28 = vpop.permute.xlu1 %711  ;;  %v846_v29 = vpop.xlane.xlu2 %845 }
 0x36d   : > { %714 = vst.msk [vmem:[#allocation3 + $0x98] sm:$0xff] %vm633_vm5, %v712_v28  ;;  %v860_v30 = vsub.f32 %v823_v0, %v846_v29 }
 0x36f   : > { %v2284_v31 = vpop.eup %1820  ;;  %v872_v32 = vmul.f32 1.442695, %v860_v30  ;;  %v728_v33 = vpop.permute.xlu0 %727 }
 0x370   : > { %730 = vst.msk [vmem:[#allocation3 + $0xb8] sm:$0xff] %vm633_vm5, %v728_v33  ;;  %v889_v34 = vsel %vm633_vm5, %v2284_v31, 0.0 }
 0x371   : > { %1822 = vpow2.f32 %v872_v32  ;;  %890 = vadd.xlane.f32.xlu0 %v889_v34  ;;  %v1740_v34 = vld [vmem:[%s2455_s5 + $0x30] sm:$0xff] }
 0x372   : > { %1019 = vmatpush.bf16.msrb.mxu2 %v1740_v34 }
 0x374   : > { %v720_v35 = vpop.permute.xlu2 %719  ;;  %v750_v44 = vld [vmem:[#allocation3 + $0x98] sm:$0xff] }
 0x375   : > { %722 = vst.msk [vmem:[#allocation3 + $0xa8] sm:$0xff] %vm633_vm5, %v720_v35  ;;  %v925_v46 = vpack.c.bf16 %v750_v44, %v749_v45  ;;  %v1734_v35 = vld [vmem:[%s2455_s5] sm:$0xff] }
 0x376   : > { %v1742_v44 = vld [vmem:[%s2455_s5 + $0x40] sm:$0xff] }
 0x377   : > { %v2290_v36 = vpop.eup %1822  ;;  %v754_v38 = vld [vmem:[#allocation3 + $0xb8] sm:$0xff]  ;;  %v1746_v45 = vld [vmem:[%s2455_s5 + $0x60] sm:$0xff] }
 0x378   : > { %v892_v39 = vsel %vm633_vm5, %v2290_v36, 0.0  ;;  %v927_v40 = vpack.c.bf16 %v754_v38, %v753_v37  ;;  %v1738_v37 = vld [vmem:[%s2455_s5 + $0x20] sm:$0xff]  ;;  %v1745_v38 = vld [vmem:[%s2455_s5 + $0x58] sm:$0xff] }
 0x379   : > { %893 = vadd.xlane.f32.xlu2 %v892_v39  ;;  %v1749_v39 = vld [vmem:[%s2455_s5 + $0x78] sm:$0xff] }
 0x37a   : > { %944 = vmatpush.bf16.msrb.mxu1 %v927_v40  ;;  %v1744_v40 = vld [vmem:[%s2455_s5 + $0x50] sm:$0xff] }
 0x37c   : > { %v752_v42 = vld [vmem:[#allocation3 + $0xa8] sm:$0xff] }
 0x37d   : > { %v926_v43 = vpack.c.bf16 %v752_v42, %v751_v41  ;;  %v1748_v41 = vld [vmem:[%s2455_s5 + $0x70] sm:$0xff]  ;;  %v1743_v42 = vld [vmem:[%s2455_s5 + $0x48] sm:$0xff] }
 0x37f   : > { %945 = vmatpush.bf16.msrb.mxu1 %v926_v43  ;;  %v1747_v43 = vld [vmem:[%s2455_s5 + $0x68] sm:$0xff] }
 0x383   : > { %946 = vmatpush.bf16.msrb.mxu1 %v925_v46 }
 0x397   : > { %v849_v47 = vpop.xlane.xlu1 %848 }
 0x398   : > { %v861_v48 = vsub.f32 %v2251_v4, %v849_v47  ;;  %v1757_v47 = vld [vmem:[%s2455_s5 + $0xb8] sm:$0xff] }
 0x39a   : > { %v874_v49 = vmul.f32 1.442695, %v861_v48  ;;  %v852_v50 = vpop.xlane.xlu0 %851 }
 0x39b   : > { %v862_v51 = vsub.f32 %v2256_v7, %v852_v50  ;;  %v1753_v50 = vld [vmem:[%s2455_s5 + $0x98] sm:$0xff] }
 0x39c   : > { %1824 = vpow2.f32 %v874_v49 }
 0x39d   : > { %v876_v52 = vmul.f32 1.442695, %v862_v51 }
 0x39f   : > { %1826 = vpow2.f32 %v876_v52  ;;  %v1752_v52 = vld [vmem:[%s2455_s5 + $0x90] sm:$0xff] }
 0x3a2   : > { %v1825_v53 = vpop.eup %1824 }
 0x3a3   : > { %v895_v58 = vsel %vm633_vm5, %v1825_v53, 0.0 }
 0x3a4   : > { %896 = vadd.xlane.f32.xlu0 %v895_v58  ;;  %v1751_v58 = vld [vmem:[%s2455_s5 + $0x88] sm:$0xff] }
 0x3a5   : > { %v1827_v59 = vpop.eup %1826 }
 0x3a6   : > { %v898_v60 = vsel %vm633_vm5, %v1827_v59, 0.0 }
 0x3a7   : > { %899 = vadd.xlane.f32.xlu1 %v898_v60 }
 0x3ad   : > { %v855_v61 = vpop.xlane.xlu2 %854 }
 0x3ae   : > { %v863_v62 = vsub.f32 %v2265_v9, %v855_v61 }
 0x3af   : > { %v704_v63 = vpop.permute.xlu1 %703 }
 0x3b0   : > { %v878_v0 = vmul.f32 1.442695, %v863_v62  ;;  %706 = vst.msk [vmem:[#allocation3 + $0x88] sm:$0xff] %vm633_vm5, %v704_v63  ;;  %v1750_v62 = vld [vmem:[%s2455_s5 + $0x80] sm:$0xff]  ;;  %v1756_v63 = vld [vmem:[%s2455_s5 + $0xb0] sm:$0xff] }
 0x3b2   : > { %1828 = vpow2.f32 %v878_v0  ;;  %v1755_v0 = vld [vmem:[%s2455_s5 + $0xa8] sm:$0xff] }
 0x3b7   : > { %v748_v2 = vld [vmem:[#allocation3 + $0x88] sm:$0xff] }
 0x3b8   : > { %v1829_v3 = vpop.eup %1828  ;;  %v924_v4 = vpack.c.bf16 %v748_v2, %v747_v1  ;;  %v1754_v1 = vld [vmem:[%s2455_s5 + $0xa0] sm:$0xff]  ;;  %v1761_v2 = vld [vmem:[%s2455_s5 + $0xd8] sm:$0xff] }
 0x3b9   : > { %v901_v5 = vsel %vm633_vm5, %v1829_v3, 0.0 }
 0x3ba   : > { %947 = vmatpush.bf16.msrb.mxu1 %v924_v4  ;;  %902 = vadd.xlane.f32.xlu2 %v901_v5  ;;  %v1765_v4 = vld [vmem:[%s2455_s5 + $0xf8] sm:$0xff]  ;;  %v1764_v5 = vld [vmem:[%s2455_s5 + $0xf0] sm:$0xff] }
 0x3d4   : > { %v885_v6 = vpop.xlane.xlu0 %884 }
 0x3d5   : > { %1830 = vrcp.f32 %v885_v6  ;;  %v1759_v6 = vld [vmem:[%s2455_s5 + $0xc8] sm:$0xff] }
 0x3da   : > { %v882_v7 = vpop.xlane.xlu1 %881 }
 0x3db   : > { %1832 = vrcp.f32 %v882_v7  ;;  %v1831_v55 = vpop.eup %1830  ;;  %v1758_v7 = vld [vmem:[%s2455_s5 + $0xc0] sm:$0xff] }
 0x3dc   : > { %v913_v57 = vmul.f32 %v1831_v55, %v2271_v19  ;;  %v888_v12 = vpop.xlane.xlu2 %887  ;;  %v1737_v19 = vld [vmem:[%s2455_s5 + $0x18] sm:$0xff]  ;;  %v1763_v55 = vld [vmem:[%s2455_s5 + $0xe8] sm:$0xff] }
 0x3dd   : > { %1058 = vmatpush.bf16.msrb.mxu3 %v1737_v19 }
 0x3e1   : > { %v1833_v56 = vpop.eup %1832  ;;  %1059 = vmatpush.bf16.msrb.mxu3 %v1736_v21 }
 0x3e2   : > { %v912_v8 = vmul.f32 %v1833_v56, %v2275_v22  ;;  %v1762_v56 = vld [vmem:[%s2455_s5 + $0xe0] sm:$0xff] }
 0x3e4   : > { %v920_v9 = vpack.c.bf16 %v913_v57, %v912_v8  ;;  %v891_v10 = vpop.xlane.xlu0 %890 }
 0x3e5   : > { %1834 = vrcp.f32 %v891_v10 }
 0x3e6   : > { %1566 = vmatmul.msk.bf16.vlgmr.msrb.gmra.mxu1 %vm633_vm5, %v920_v9  ;;  %1836 = vrcp.f32 %v888_v12 }
 0x3eb   : > { %v1835_v13 = vpop.eup %1834 }
 0x3ec   : > { %v1837_v14 = vpop.eup %1836  ;;  %v915_v15 = vmul.f32 %v1835_v13, %v2284_v31  ;;  %v894_v17 = vpop.xlane.xlu2 %893 }
 0x3ed   : > { %v914_v16 = vmul.f32 %v1837_v14, %v2279_v25  ;;  %1838 = vrcp.f32 %v894_v17  ;;  %v1735_v25 = vld [vmem:[%s2455_s5 + $0x8] sm:$0xff] }
 0x3ee   : > { %1060 = vmatpush.bf16.msrb.mxu3 %v1735_v25 }
 0x3ef   : > { %v921_v11 = vpack.c.bf16 %v915_v15, %v914_v16 }
 0x3f2   : > { %1061 = vmatpush.bf16.msrb.mxu3 %v1734_v35 }
 0x3f3   : > { %v1839_v22 = vpop.eup %1838 }
 0x3f4   : > { %v916_v23 = vmul.f32 %v1839_v22, %v2290_v36  ;;  %v1739_v36 = vld [vmem:[%s2455_s5 + $0x28] sm:$0xff] }
 0x3f5   : > { %1020 = vmatpush.bf16.msrb.mxu2 %v1739_v36 }
 0x3f6   : > { %1567 = vmatmul.msk.bf16.gmra.mxu1 %vm633_vm5, %v921_v11  ;;  %1157 = vmatpush.bf16.msra.mxu3 %v1749_v39 }
 0x3f9   : > { %1021 = vmatpush.bf16.msrb.mxu2 %v1738_v37 }
 0x3fa   : > { %1158 = vmatpush.bf16.msra.mxu3 %v1748_v41 }
 0x3fd   : > { %1107 = vmatpush.bf16.msra.mxu2 %v1745_v38 }
 0x3fe   : > { %1159 = vmatpush.bf16.msra.mxu3 %v1747_v43 }
 0x401   : > { %1108 = vmatpush.bf16.msra.mxu2 %v1744_v40 }
 0x402   : > { %1160 = vmatpush.bf16.msra.mxu3 %v1746_v45 }
 0x405   : > { %1109 = vmatpush.bf16.msra.mxu2 %v1743_v42 }
 0x409   : > { %1110 = vmatpush.bf16.msra.mxu2 %v1742_v44 }
 0x417   : > { %v897_v18 = vpop.xlane.xlu0 %896 }
 0x418   : > { %1840 = vrcp.f32 %v897_v18 }
 0x41a   : > { %v900_v27 = vpop.xlane.xlu1 %899 }
 0x41b   : > { %1842 = vrcp.f32 %v900_v27 }
 0x41e   : > { %v1841_v54 = vpop.eup %1840 }
 0x41f   : > { %v917_v24 = vmul.f32 %v1841_v54, %v1825_v53 }
 0x421   : > { %v922_v26 = vpack.c.bf16 %v917_v24, %v916_v23  ;;  %v1843_v29 = vpop.eup %1842 }
 0x422   : > { %v918_v31 = vmul.f32 %v1843_v29, %v1827_v59 }
 0x423   : > { %1568 = vmatmul.msk.bf16.gmra.mxu1 %vm633_vm5, %v922_v26 }
 0x42d   : > { %v903_v28 = vpop.xlane.xlu2 %902 }
 0x42e   : > { %1844 = vrcp.f32 %v903_v28 }
 0x434   : > { %v1845_v30 = vpop.eup %1844 }
 0x435   : > { %v919_v32 = vmul.f32 %v1845_v30, %v1829_v3  ;;  %v1760_v3 = vld [vmem:[%s2455_s5 + $0xd0] sm:$0xff] }
 0x437   : > { %v923_v33 = vpack.c.bf16 %v919_v32, %v918_v31 }
 0x439   : > { %1569 = vmatmul.msk.bf16.gmra.mxu1 %vm633_vm5, %v923_v33  ;;  %v1809_v33 = vld [vmem:[%s2456_s6] ss:$0 sm:$0xff] }
 0x463   : > { %v949_v46 = vpop.f32.mrf.mxu1 }
 0x464   : > { %v969_v48 = vpack.c.bf16 %v949_v46, %v949_v46 }
 0x466   : > { %1603 = vmatmul.msk.bf16.vlgmr.msrb.gmra.mxu3 %vm633_vm5, %v969_v48 }
 0x467   : > { %1257 = vmatpush.bf16.msrb.mxu3 %v1757_v47 }
 0x46b   : > { %v951_v49 = vpop.f32.mrf.mxu1  ;;  %1258 = vmatpush.bf16.msrb.mxu3 %v1756_v63 }
 0x46c   : > { %v978_v51 = vpack.c.bf16 %v951_v49, %v951_v49 }
 0x46e   : > { %1586 = vmatmul.msk.bf16.vlgmr.msrb.gmra.mxu2 %vm633_vm5, %v978_v51 }
 0x46f   : > { %1207 = vmatpush.bf16.msrb.mxu2 %v1753_v50  ;;  %1259 = vmatpush.bf16.msrb.mxu3 %v1755_v0 }
 0x473   : > { %v954_v53 = vpop.f32.mrf.mxu1  ;;  %1208 = vmatpush.bf16.msrb.mxu2 %v1752_v52  ;;  %1260 = vmatpush.bf16.msrb.mxu3 %v1754_v1 }
 0x474   : > { %v1067_v60 = vpack.c.bf16 %v954_v53, %v954_v53 }
 0x477   : > { %1209 = vmatpush.bf16.msrb.mxu2 %v1751_v58 }
 0x47b   : > { %v956_v59 = vpop.f32.mrf.mxu1  ;;  %1210 = vmatpush.bf16.msrb.mxu2 %v1750_v62 }
 0x47c   : > { %v1117_v61 = vpack.c.bf16 %v956_v59, %v956_v59 }
 0x47e   : > { %1620 = vmatmul.msk.bf16.vlgmr.msra.gmra.mxu2 %vm633_vm5, %v1067_v60  ;;  %1637 = vmatmul.msk.bf16.vlgmr.msra.gmra.mxu3 %vm633_vm5, %v1117_v61 }
 0x47f   : > { %1307 = vmatpush.bf16.msra.mxu2 %v1761_v2  ;;  %1357 = vmatpush.bf16.msra.mxu3 %v1765_v4 }
 0x483   : > { %1308 = vmatpush.bf16.msra.mxu2 %v1760_v3  ;;  %1358 = vmatpush.bf16.msra.mxu3 %v1764_v5 }
 0x487   : > { %1309 = vmatpush.bf16.msra.mxu2 %v1759_v6  ;;  %1359 = vmatpush.bf16.msra.mxu3 %v1763_v55 }
 0x48b   : > { %1310 = vmatpush.bf16.msra.mxu2 %v1758_v7  ;;  %1360 = vmatpush.bf16.msra.mxu3 %v1762_v56 }
 0x4a0   : > { %v959_v57 = vpop.f32.mrf.mxu1 }
 0x4a1   : > { %v1167_v8 = vpack.c.bf16 %v959_v57, %v959_v57 }
 0x4a3   : > { %1654 = vmatmul.msk.bf16.vlgmr.msrb.gmra.mxu2 %vm633_vm5, %v1167_v8 }
 0x4a8   : > { %v961_v9 = vpop.f32.mrf.mxu1 }
 0x4a9   : > { %v1217_v10 = vpack.c.bf16 %v961_v9, %v961_v9 }
 0x4ab   : > { %1671 = vmatmul.msk.bf16.vlgmr.msrb.gmra.mxu3 %vm633_vm5, %v1217_v10 }
 0x4b6   : > { %v964_v12 = vpop.f32.mrf.mxu1 }
 0x4b7   : > { %v1267_v13 = vpack.c.bf16 %v964_v12, %v964_v12 }
 0x4b9   : > { %1688 = vmatmul.msk.bf16.vlgmr.msra.gmra.mxu2 %vm633_vm5, %v1267_v13 }
 0x4be   : > { %v966_v14 = vpop.f32.mrf.mxu1 }
 0x4bf   : > { %v1317_v15 = vpack.c.bf16 %v966_v14, %v966_v14 }
 0x4c1   : > { %1705 = vmatmul.msk.bf16.vlgmr.msra.gmra.mxu3 %vm633_vm5, %v1317_v15 }
 0x4e9   : > { %v1063_v16 = vpop.f32.mrf.mxu3 }
 0x4f1   : > { %v1023_v11 = vpop.f32.mrf.mxu2  ;;  %v1065_v17 = vpop.f32.mrf.mxu3 }
 0x4f2   : > { %v1064_v18 = vadd.f32 %v1063_v16, %v1023_v11 }
 0x4f9   : > { %v1025_v19 = vpop.f32.mrf.mxu2 }
 0x501   : > { %v1112_v20 = vpop.f32.mrf.mxu2  ;;  %v1162_v21 = vpop.f32.mrf.mxu3 }
 0x502   : > { %v1116_v27 = vadd.f32 %v1112_v20, %v1064_v18 }
 0x504   : > { %v1166_v29 = vadd.f32 %v1162_v21, %v1116_v27 }
 0x509   : > { %v1114_v22 = vpop.f32.mrf.mxu2  ;;  %v1164_v54 = vpop.f32.mrf.mxu3 }
 0x526   : > { %v1212_v23 = vpop.f32.mrf.mxu2 }
 0x527   : > { %v1216_v30 = vadd.f32 %v1212_v23, %v1166_v29 }
 0x52e   : > { %v1214_v24 = vpop.f32.mrf.mxu2  ;;  %v1262_v25 = vpop.f32.mrf.mxu3 }
 0x52f   : > { %v1266_v31 = vadd.f32 %v1262_v25, %v1216_v30 }
 0x536   : > { %v1264_v26 = vpop.f32.mrf.mxu3 }
 0x53c   : > { %v1312_v28 = vpop.f32.mrf.mxu2 }
 0x53d   : > { %v1316_v32 = vadd.f32 %v1312_v28, %v1266_v31 }
 0x544   : > { %v1314_v34 = vpop.f32.mrf.mxu2  ;;  %v1362_v35 = vpop.f32.mrf.mxu3 }
 0x545   : > { %v1366_v36 = vadd.f32 %v1362_v35, %v1316_v32 }
 0x547   : > { %v1371_v37 = vadd.f32 %v1809_v33, %v1366_v36 }
 0x549   : > { %1372 = vst.msk [vmem:[%s269_s8] sm:$0xff] %vm276_vm0, %v1371_v37 }
 0x54a   : > { %1873 = shalt.err (!%p1870_p3)
}
 0x54b   : > { %1766 = dma.vmem_to_hbm [thread:$0]  (%p1990_p5), %s1387_s9, 128, %s1389_s13, %s1374_s28  }
 0x54c   : > { %v1364_v38 = vpop.f32.mrf.mxu3 }
 0x54d PF: > { %p1772_p4 = scmp.ge.s32.totalorder %s1908_s27, 2  ;;  %s1400_s17 = sand.u32 1, %s1896_s24  }
 0x54e   : > { %s1401_s23 = scalar_lea.sflag [#allocation5], %s1400_s17 }
 0x54f   : > { %p1769_p7 = pnand %p1772_p4, %p1994_p6 }
 0x551   : > { %p1770_p8 = pneg %p1769_p7 }
 0x553   : > { %1891 = dma.done.wait (%p1770_p8), %s1401_s23, 128  }
 0x554   : > { %1893 = vsyncadd (%p1770_p8), %s1401_s23, 4294967168  ;;  %p17_p9 = scmp.ge.s32.totalorder %s1977_s30, 4   ;;  %s2460_s24 = smov %s1900_s25 }
 0x555   : > { %s2461_s25 = smov %s1904_s26  ;;  %s2462_s26 = smov %s1988_s10 }
 0x556   : > { %s2463_s27 = smov %s1977_s30  ;;  %19 = sbr.rel (!%p17_p9) target bundleno = 3 (0x3), region = 85 }
 0x55b   :  { %1407 = vsyncpa [#allocation5], 1 }
 0x55c   :  { %1409 = vsyncpa [#allocation5 + $0x1], 1 }

</bundles_post_ra>
